<compile_context>
chip_gen: v5e
topology: v5e:2x2
jax: 0.10.0
libtpu: 0.0.40
codegen_flags: <defaults>
</compile_context>

<pallas_src>
import functools

import numpy as np

import jax
import jax.numpy as jnp
from jax.experimental import pallas as pl
from jax.experimental.pallas import tpu as pltpu


# ----------------------------- Pallas kernel --------------------------------


def _banded_conv(xf, m_refs, b_row_ref, h_out):
    """3x3 conv as 3 accumulating matmuls over a lane-folded (width*chan) layout.

    xf:        (N, h_in, w_in_cols) value; minor axis is (width * in_channels)
    m_refs:    three refs, each (w_in_cols, w_out_cols) banded weight matrix
               (one per kernel row kh), built host-side
    b_row_ref: (1, w_out_cols) bias, pre-tiled along the folded lane axis
    h_out:     number of output rows per image (valid conv over h_in = h_out+2)
    returns:   (N * h_out, w_out_cols) float32
    """
    n, _, w_in_cols = xf.shape
    acc = None
    for kh in range(3):
        # Shift by kh rows (sublane axis); static slice of a value.
        rows = jax.lax.slice(xf, (0, kh, 0), (n, kh + h_out, w_in_cols))
        # Merge leading dims only (minor dim untouched) -> cheap reshape.
        rows2d = rows.reshape(n * h_out, w_in_cols)
        part = jnp.dot(rows2d, m_refs[kh][...],
                       preferred_element_type=jnp.float32)
        acc = part if acc is None else acc + part
    return acc + b_row_ref[...]


def _fused_model_kernel(xw_ref, m10_ref, m11_ref, m12_ref, b1_ref,
                        m20_ref, m21_ref, m22_ref, b2_ref, mask_ref,
                        a1p_ref, h2_ref, *, N, H, W, C1, C2):
    """conv1 + ReLU + conv2 for the whole batch in one invocation.

    xw_ref:   (N, H+4, (W+4)*Cin)  input, zero-padded by 2, lane-folded
    m1*_ref:  (  (W+4)*Cin, (W+2)*C1 )  banded conv1 weights (per kh)
    b1_ref:   (1, (W+2)*C1)
    m2*_ref:  (  (W+2)*C1,  W*C2    )  banded conv2 weights (per kh)
    b2_ref:   (1, W*C2)
    mask_ref: (N*(H+2), (W+2)*C1)  1 in the interior, 0 on the halo ring
    a1p_ref:  (N, H+2, (W+2)*C1)   OUT: relu1 output on the padded-by-1 grid
    h2_ref:   (N, H,   W*C2)       OUT: conv2 pre-activation (lane-dense)
    """
    Hp, Wp = H + 2, W + 2

    # conv1 (+ fused ReLU), evaluated on the padded-by-1 output grid so that,
    # with the halo ring forced to exact zero, the result is directly conv2's
    # zero-padded input.
    a1p_flat = _banded_conv(xw_ref[...], (m10_ref, m11_ref, m12_ref), b1_ref, Hp)
    a1p_flat = jnp.maximum(a1p_flat, 0.0) * mask_ref[...]        # (N*Hp, Wp*C1)
    a1p = a1p_flat.reshape(N, Hp, Wp * C1)                       # split leading dims only

    # Hooked INPUT of conv2 (= relu1 output) -- stored lane-dense; the wrapper
    # slices out the interior (the halo is just zeros).
    a1p_ref[...] = a1p

    # conv2 pre-activation = hooked OUTPUT, lane-dense (W*C2 = 128 lanes).
    h2_flat = _banded_conv(a1p, (m20_ref, m21_ref, m22_ref), b2_ref, H)
    h2_ref[...] = h2_flat.reshape(N, H, W * C2)

    # relu2 of the wrapped model is dead compute for the hook (its result is
    # discarded by HookBasedFeatureExtractor.forward), so it is not emitted.


# --------------------- host-side parameter preprocessing --------------------


def _banded_weights(w_hwio, w_in, w_out):
    """Per-kernel-row banded (block-Toeplitz) matrices for the folded layout.

    w_hwio: (3, 3, Cin, Cout).  Returns 3 matrices of shape
    (w_in*Cin, w_out*Cout) such that, for input rows folded as (width, Cin) on
    the minor axis, `row @ M_kh` yields the kh-row contribution of a valid 3x3
    conv with output folded as (width, Cout).
    """
    w = np.asarray(w_hwio, np.float32)
    _, _, cin, cout = w.shape
    mats = []
    for kh in range(3):
        m = np.zeros((w_in * cin, w_out * cout), np.float32)
        for kw in range(3):
            for j in range(w_out):
                m[(j + kw) * cin:(j + kw + 1) * cin,
                  j * cout:(j + 1) * cout] = w[kh, kw]
        mats.append(jnp.asarray(m))
    return mats


def init_params():
    """Deterministic synthetic weights for conv1 (4->8) and conv2 (8->8)."""
    k = jax.random.PRNGKey(42)
    k1, k2, k3, k4 = jax.random.split(k, 4)
    C_IN, C1, C2 = 4, 8, 8
    w1 = jax.random.normal(k1, (3, 3, C_IN, C1), jnp.float32) * 0.1   # HWIO
    b1 = jax.random.normal(k2, (C1,), jnp.float32) * 0.1
    w2 = jax.random.normal(k3, (3, 3, C1, C2), jnp.float32) * 0.1
    b2 = jax.random.normal(k4, (C2,), jnp.float32) * 0.1
    return {"conv1": (w1, b1), "conv2": (w2, b2)}


# ------------------- hook-based feature extractor (wrapper) -----------------


def hook_based_feature_extractor(x_nchw, params, layer_name=("conv2",)):
    """Mirrors HookBasedFeatureExtractor.forward for the synthetic model.

    Runs the full model forward (conv1 -> relu1 -> conv2 -> [relu2]) in a
    single fused Pallas kernel and returns the hooked layer's (input, output)
    in NCHW, like the PyTorch hook would store them.
    """
    assert tuple(layer_name) == ("conv2",)   # _verify_layer_name equivalent
    N, Cin, H, W = x_nchw.shape
    w1, b1 = params["conv1"]
    w2, b2 = params["conv2"]
    C1, C2 = w1.shape[-1], w2.shape[-1]
    Hp, Wp = H + 2, W + 2

    # NCHW -> NHWC, zero-pad by 2 (conv1 runs on the padded-by-1 grid), fold
    # (width, channels) onto the lane axis.  All thin XLA layout plumbing.
    x_nhwc = jnp.transpose(x_nchw, (0, 2, 3, 1))
    xpad2 = jnp.pad(x_nhwc, ((0, 0), (2, 2), (2, 2), (0, 0)))
    xw = xpad2.reshape(N, H + 4, (W + 4) * Cin)

    # Host-side (one-off) weight/bias/mask preprocessing.
    m1 = _banded_weights(w1, W + 4, Wp)          # 3 x (80, 144)
    m2 = _banded_weights(w2, Wp, W)              # 3 x (144, 128)
    b1_row = jnp.asarray(np.tile(np.asarray(b1, np.float32), Wp))[None, :]
    b2_row = jnp.asarray(np.tile(np.asarray(b2, np.float32), W))[None, :]
    mnp = np.zeros((N, Hp, Wp, C1), np.float32)
    mnp[:, 1:H + 1, 1:W + 1, :] = 1.0            # interior = 1, halo ring = 0
    mask = jnp.asarray(mnp.reshape(N * Hp, Wp * C1))

    kernel = functools.partial(_fused_model_kernel, N=N, H=H, W=W, C1=C1, C2=C2)
    vmem_spec = pl.BlockSpec(memory_space=pltpu.MemorySpace.VMEM)
    a1p_out, h2_dense = pl.pallas_call(
        kernel,
        out_shape=(jax.ShapeDtypeStruct((N, Hp, Wp * C1), jnp.float32),
                   jax.ShapeDtypeStruct((N, H, W * C2), jnp.float32)),
        in_specs=[vmem_spec] * 10,
        out_specs=(vmem_spec, vmem_spec),
    )(xw, m1[0], m1[1], m1[2], b1_row, m2[0], m2[1], m2[2], b2_row, mask)

    # Unfold the lane-dense results and convert back to NCHW, as the PyTorch
    # hook stores them.
    a1 = a1p_out.reshape(N, Hp, Wp, C1)[:, 1:H + 1, 1:W + 1, :]   # relu1 output
    h2 = h2_dense.reshape(N, H, W, C2)                            # conv2 pre-act
    hooked_input = jnp.transpose(a1, (0, 3, 1, 2))
    hooked_output = jnp.transpose(h2, (0, 3, 1, 2))
    return [hooked_input], [hooked_output]       # like self.inputs / self.outputs


# ----------------------------- reference & test ------------------------------


def _reference_conv(x_nhwc, w_hwio, b):
    y = jax.lax.conv_general_dilated(
        x_nhwc, w_hwio, window_strides=(1, 1), padding="SAME",
        dimension_numbers=("NHWC", "HWIO", "NHWC"))
    return y + b[None, None, None, :]


if __name__ == "__main__":
    key = jax.random.PRNGKey(0)
    x = jax.random.normal(key, (2, 4, 16, 16), jnp.float32)   # NCHW, like PyTorch

    params = init_params()
    inputs_list, outputs_list = hook_based_feature_extractor(x, params, ["conv2"])
    hooked_in = jax.block_until_ready(inputs_list[0])
    hooked_out = jax.block_until_ready(outputs_list[0])

    # Sanity check against the XLA conv reference.
    x_nhwc = jnp.transpose(x, (0, 2, 3, 1))
    w1, b1 = params["conv1"]
    w2, b2 = params["conv2"]
    ref_a1 = jnp.maximum(_reference_conv(x_nhwc, w1, b1), 0.0)
    ref_h2 = _reference_conv(ref_a1, w2, b2)
    assert hooked_in.shape == (2, 8, 16, 16) and hooked_out.shape == (2, 8, 16, 16)
    assert jnp.allclose(hooked_in, jnp.transpose(ref_a1, (0, 3, 1, 2)), atol=1e-4)
    assert jnp.allclose(hooked_out, jnp.transpose(ref_h2, (0, 3, 1, 2)), atol=1e-4)

    print("KERNEL_OK")
</pallas_src>

<mosaic_0001>
module attributes {stable_mosaic.version = 11 : i64} {
  func.func @_fused_model_kernel(%arg0: memref<2x20x80xf32, #tpu.memory_space<vmem>>, %arg1: memref<80x144xf32, #tpu.memory_space<vmem>>, %arg2: memref<80x144xf32, #tpu.memory_space<vmem>>, %arg3: memref<80x144xf32, #tpu.memory_space<vmem>>, %arg4: memref<1x144xf32, #tpu.memory_space<vmem>>, %arg5: memref<144x128xf32, #tpu.memory_space<vmem>>, %arg6: memref<144x128xf32, #tpu.memory_space<vmem>>, %arg7: memref<144x128xf32, #tpu.memory_space<vmem>>, %arg8: memref<1x128xf32, #tpu.memory_space<vmem>>, %arg9: memref<36x144xf32, #tpu.memory_space<vmem>>, %arg10: memref<2x18x144xf32, #tpu.memory_space<vmem>>, %arg11: memref<2x16x128xf32, #tpu.memory_space<vmem>>) attributes {dimension_semantics = [], scalar_prefetch = 0 : i64, scratch_operands = 0 : i64, tpu.core_type = #tpu.core_type<tc>} {
    %c0 = arith.constant 0 : index
    %c0_0 = arith.constant 0 : index
    %c0_1 = arith.constant 0 : index
    %0 = vector.load %arg0[%c0, %c0_0, %c0_1] : memref<2x20x80xf32, #tpu.memory_space<vmem>>, vector<2x20x80xf32>
    %1 = vector.extract_strided_slice %0 {offsets = [0, 0, 0], sizes = [2, 18, 80], strides = [1, 1, 1]} : vector<2x20x80xf32> to vector<2x18x80xf32>
    %2 = vector.shape_cast %1 : vector<2x18x80xf32> to vector<36x80xf32>
    %c0_2 = arith.constant 0 : index
    %c0_3 = arith.constant 0 : index
    %3 = vector.load %arg1[%c0_2, %c0_3] : memref<80x144xf32, #tpu.memory_space<vmem>>, vector<80x144xf32>
    %cst = arith.constant dense<0.000000e+00> : vector<36x144xf32>
    %4 = tpu.matmul %2, %3, %cst {dimension_numbers = #tpu.dot_dimension_numbers<[1], [0], [0], [1], [0, 0, 1, 1], [], []>} : vector<36x80xf32>, vector<80x144xf32>, vector<36x144xf32> -> vector<36x144xf32>
    %5 = vector.extract_strided_slice %0 {offsets = [0, 1, 0], sizes = [2, 18, 80], strides = [1, 1, 1]} : vector<2x20x80xf32> to vector<2x18x80xf32>
    %6 = vector.shape_cast %5 : vector<2x18x80xf32> to vector<36x80xf32>
    %c0_4 = arith.constant 0 : index
    %c0_5 = arith.constant 0 : index
    %7 = vector.load %arg2[%c0_4, %c0_5] : memref<80x144xf32, #tpu.memory_space<vmem>>, vector<80x144xf32>
    %cst_6 = arith.constant dense<0.000000e+00> : vector<36x144xf32>
    %8 = tpu.matmul %6, %7, %cst_6 {dimension_numbers = #tpu.dot_dimension_numbers<[1], [0], [0], [1], [0, 0, 1, 1], [], []>} : vector<36x80xf32>, vector<80x144xf32>, vector<36x144xf32> -> vector<36x144xf32>
    %9 = arith.addf %4, %8 : vector<36x144xf32>
    %10 = vector.extract_strided_slice %0 {offsets = [0, 2, 0], sizes = [2, 18, 80], strides = [1, 1, 1]} : vector<2x20x80xf32> to vector<2x18x80xf32>
    %11 = vector.shape_cast %10 : vector<2x18x80xf32> to vector<36x80xf32>
    %c0_7 = arith.constant 0 : index
    %c0_8 = arith.constant 0 : index
    %12 = vector.load %arg3[%c0_7, %c0_8] : memref<80x144xf32, #tpu.memory_space<vmem>>, vector<80x144xf32>
    %cst_9 = arith.constant dense<0.000000e+00> : vector<36x144xf32>
    %13 = tpu.matmul %11, %12, %cst_9 {dimension_numbers = #tpu.dot_dimension_numbers<[1], [0], [0], [1], [0, 0, 1, 1], [], []>} : vector<36x80xf32>, vector<80x144xf32>, vector<36x144xf32> -> vector<36x144xf32>
    %14 = arith.addf %9, %13 : vector<36x144xf32>
    %c0_10 = arith.constant 0 : index
    %c0_11 = arith.constant 0 : index
    %15 = vector.load %arg4[%c0_10, %c0_11] : memref<1x144xf32, #tpu.memory_space<vmem>>, vector<1x144xf32>
    %16 = vector.broadcast %15 : vector<1x144xf32> to vector<36x144xf32>
    %17 = arith.addf %14, %16 : vector<36x144xf32>
    %cst_12 = arith.constant 0.000000e+00 : f32
    %18 = vector.broadcast %cst_12 : f32 to vector<36x144xf32>
    %19 = arith.maximumf %17, %18 : vector<36x144xf32>
    %c0_13 = arith.constant 0 : index
    %c0_14 = arith.constant 0 : index
    %20 = vector.load %arg9[%c0_13, %c0_14] : memref<36x144xf32, #tpu.memory_space<vmem>>, vector<36x144xf32>
    %21 = arith.mulf %19, %20 : vector<36x144xf32>
    %22 = vector.shape_cast %21 : vector<36x144xf32> to vector<2x18x144xf32>
    %c0_15 = arith.constant 0 : index
    %c0_16 = arith.constant 0 : index
    %c0_17 = arith.constant 0 : index
    %23 = vector.load %arg10[%c0_15, %c0_16, %c0_17] : memref<2x18x144xf32, #tpu.memory_space<vmem>>, vector<2x18x144xf32>
    tpu.vector_store %arg10[%c0_15, %c0_16, %c0_17], %22 {strides = array<i32>} : memref<2x18x144xf32, #tpu.memory_space<vmem>>, vector<2x18x144xf32>,
    %24 = vector.extract_strided_slice %22 {offsets = [0, 0, 0], sizes = [2, 16, 144], strides = [1, 1, 1]} : vector<2x18x144xf32> to vector<2x16x144xf32>
    %25 = vector.shape_cast %24 : vector<2x16x144xf32> to vector<32x144xf32>
    %c0_18 = arith.constant 0 : index
    %c0_19 = arith.constant 0 : index
    %26 = vector.load %arg5[%c0_18, %c0_19] : memref<144x128xf32, #tpu.memory_space<vmem>>, vector<144x128xf32>
    %cst_20 = arith.constant dense<0.000000e+00> : vector<32x128xf32>
    %27 = tpu.matmul %25, %26, %cst_20 {dimension_numbers = #tpu.dot_dimension_numbers<[1], [0], [0], [1], [0, 0, 1, 1], [], []>} : vector<32x144xf32>, vector<144x128xf32>, vector<32x128xf32> -> vector<32x128xf32>
    %28 = vector.extract_strided_slice %22 {offsets = [0, 1, 0], sizes = [2, 16, 144], strides = [1, 1, 1]} : vector<2x18x144xf32> to vector<2x16x144xf32>
    %29 = vector.shape_cast %28 : vector<2x16x144xf32> to vector<32x144xf32>
    %c0_21 = arith.constant 0 : index
    %c0_22 = arith.constant 0 : index
    %30 = vector.load %arg6[%c0_21, %c0_22] : memref<144x128xf32, #tpu.memory_space<vmem>>, vector<144x128xf32>
    %cst_23 = arith.constant dense<0.000000e+00> : vector<32x128xf32>
    %31 = tpu.matmul %29, %30, %cst_23 {dimension_numbers = #tpu.dot_dimension_numbers<[1], [0], [0], [1], [0, 0, 1, 1], [], []>} : vector<32x144xf32>, vector<144x128xf32>, vector<32x128xf32> -> vector<32x128xf32>
    %32 = arith.addf %27, %31 : vector<32x128xf32>
    %33 = vector.extract_strided_slice %22 {offsets = [0, 2, 0], sizes = [2, 16, 144], strides = [1, 1, 1]} : vector<2x18x144xf32> to vector<2x16x144xf32>
    %34 = vector.shape_cast %33 : vector<2x16x144xf32> to vector<32x144xf32>
    %c0_24 = arith.constant 0 : index
    %c0_25 = arith.constant 0 : index
    %35 = vector.load %arg7[%c0_24, %c0_25] : memref<144x128xf32, #tpu.memory_space<vmem>>, vector<144x128xf32>
    %cst_26 = arith.constant dense<0.000000e+00> : vector<32x128xf32>
    %36 = tpu.matmul %34, %35, %cst_26 {dimension_numbers = #tpu.dot_dimension_numbers<[1], [0], [0], [1], [0, 0, 1, 1], [], []>} : vector<32x144xf32>, vector<144x128xf32>, vector<32x128xf32> -> vector<32x128xf32>
    %37 = arith.addf %32, %36 : vector<32x128xf32>
    %c0_27 = arith.constant 0 : index
    %c0_28 = arith.constant 0 : index
    %38 = vector.load %arg8[%c0_27, %c0_28] : memref<1x128xf32, #tpu.memory_space<vmem>>, vector<1x128xf32>
    %39 = vector.broadcast %38 : vector<1x128xf32> to vector<32x128xf32>
    %40 = arith.addf %37, %39 : vector<32x128xf32>
    %41 = vector.shape_cast %40 : vector<32x128xf32> to vector<2x16x128xf32>
    %c0_29 = arith.constant 0 : index
    %c0_30 = arith.constant 0 : index
    %c0_31 = arith.constant 0 : index
    %42 = vector.load %arg11[%c0_29, %c0_30, %c0_31] : memref<2x16x128xf32, #tpu.memory_space<vmem>>, vector<2x16x128xf32>
    tpu.vector_store %arg11[%c0_29, %c0_30, %c0_31], %41 {strides = array<i32>} : memref<2x16x128xf32, #tpu.memory_space<vmem>>, vector<2x16x128xf32>,
    return
  }
}

</mosaic_0001>

<bundles_post_ra>
// kernel: tpu_custom_call.1
= control target key start
LH: loop header
LB: loop body
LE: loop exit
PB: predicated region body
PF: predicated region fallthrough
CT: control target
= control target key end

     0   :  { %vm84_vm0 = vcmask 1040384   ;;  %vm85_vm1 = vcmask 1042434   ;;  %vm87_vm2 = vcmask 1044484   ;;  %vm89_vm3 = vcmask 1046534   ;;  %s2103_s0 = inlined_call_operand.vmem [shape: f32[2,20,80], index: 0, kind: input, shape index: {}]   ;;  %s2104_s1 = inlined_call_operand.vmem [shape: f32[80,144], index: 1, kind: input, shape index: {}]   ;;  %s2105_s2 = inlined_call_operand.vmem [shape: f32[80,144], index: 2, kind: input, shape index: {}]   ;;  %s2106_s3 = inlined_call_operand.vmem [shape: f32[80,144], index: 3, kind: input, shape index: {}]   ;;  %s2107_s4 = inlined_call_operand.vmem [shape: f32[1,144], index: 4, kind: input, shape index: {}]   ;;  %s2108_s5 = inlined_call_operand.vmem [shape: f32[144,128], index: 5, kind: input, shape index: {}]   ;;  %s2109_s6 = inlined_call_operand.vmem [shape: f32[144,128], index: 6, kind: input, shape index: {}]   ;;  %s2110_s7 = inlined_call_operand.vmem [shape: f32[144,128], index: 7, kind: input, shape index: {}]   ;;  %s2111_s8 = inlined_call_operand.vmem [shape: f32[1,128], index: 8, kind: input, shape index: {}]   ;;  %s2112_s9 = inlined_call_operand.vmem [shape: f32[36,144], index: 9, kind: input, shape index: {}]   ;;  %s2113_s10 = inlined_call_operand.vmem [shape: f32[2,18,144], index: 10, kind: output, shape index: {0}]   ;;  %s2114_s11 = inlined_call_operand.hbm [shape: f32[2,16,128], index: 11, kind: output, shape index: {1}]  }
   0x1   :  { %v81_v0 = vld [vmem:[%s2104_s1 + $0x98] sm:$0xff]  ;;  %v80_v1 = vld [vmem:[%s2104_s1 + $0x90] sm:$0xff]  ;;  %v79_v2 = vld [vmem:[%s2104_s1 + $0x88] sm:$0xff] }
   0x2   :  { %350 = vmatpush.msra.mxu3 %v81_v0  ;;  %318 = vmatpush.msra.mxu2 %v80_v1  ;;  %v78_v3 = vld [vmem:[%s2104_s1 + $0x80] sm:$0xff]  ;;  %v165_v4 = vld [vmem:[%s2105_s2 + $0x90] sm:$0xff]  ;;  %v77_v5 = vld [vmem:[%s2104_s1 + $0x78] sm:$0xff] }
   0x3   :  { %214 = vmatpush.msra.mxu0 %v165_v4  ;;  %v166_v6 = vld [vmem:[%s2105_s2 + $0x98] sm:$0xff]  ;;  %v76_v7 = vld [vmem:[%s2104_s1 + $0x70] sm:$0xff]  ;;  %v163_v8 = vld [vmem:[%s2105_s2 + $0x80] sm:$0xff] }
   0x4   :  { %351 = vmatpush.msra.mxu3 %v79_v2  ;;  %319 = vmatpush.msra.mxu2 %v78_v3  ;;  %v164_v9 = vld [vmem:[%s2105_s2 + $0x88] sm:$0xff]  ;;  %v74_v11 = vld [vmem:[%s2104_s1 + $0x60] sm:$0xff]  ;;  %v161_v12 = vld [vmem:[%s2105_s2 + $0x70] sm:$0xff] }
   0x5   :  { %246 = vmatpush.msra.mxu1 %v166_v6  ;;  %v75_v10 = vld [vmem:[%s2104_s1 + $0x68] sm:$0xff]  ;;  %215 = vmatpush.msra.mxu0 %v163_v8  ;;  %v162_v13 = vld [vmem:[%s2105_s2 + $0x78] sm:$0xff]  ;;  %v159_v14 = vld [vmem:[%s2105_s2 + $0x60] sm:$0xff] }
   0x6   :  { %352 = vmatpush.msra.mxu3 %v77_v5  ;;  %320 = vmatpush.msra.mxu2 %v76_v7  ;;  %v73_v15 = vld [vmem:[%s2104_s1 + $0x58] sm:$0xff]  ;;  %v72_v16 = vld [vmem:[%s2104_s1 + $0x50] sm:$0xff]  ;;  %v160_v17 = vld [vmem:[%s2105_s2 + $0x68] sm:$0xff] }
   0x7   :  { %247 = vmatpush.msra.mxu1 %v164_v9  ;;  %216 = vmatpush.msra.mxu0 %v161_v12  ;;  %v157_v18 = vld [vmem:[%s2105_s2 + $0x50] sm:$0xff]  ;;  %v71_v19 = vld [vmem:[%s2104_s1 + $0x48] sm:$0xff]  ;;  %v70_v20 = vld [vmem:[%s2104_s1 + $0x40] sm:$0xff] }
   0x8   :  { %353 = vmatpush.msra.mxu3 %v75_v10  ;;  %321 = vmatpush.msra.mxu2 %v74_v11  ;;  %v158_v21 = vld [vmem:[%s2105_s2 + $0x58] sm:$0xff]  ;;  %v155_v22 = vld [vmem:[%s2105_s2 + $0x40] sm:$0xff]  ;;  %v68_v24 = vld [vmem:[%s2104_s1 + $0x30] sm:$0xff] }
   0x9   :  { %248 = vmatpush.msra.mxu1 %v162_v13  ;;  %217 = vmatpush.msra.mxu0 %v159_v14  ;;  %v69_v23 = vld [vmem:[%s2104_s1 + $0x38] sm:$0xff]  ;;  %v67_v25 = vld [vmem:[%s2104_s1 + $0x28] sm:$0xff]  ;;  %v153_v27 = vld [vmem:[%s2105_s2 + $0x30] sm:$0xff] }
   0xa   :  { %354 = vmatpush.msra.mxu3 %v73_v15  ;;  %322 = vmatpush.msra.mxu2 %v72_v16  ;;  %v156_v26 = vld [vmem:[%s2105_s2 + $0x48] sm:$0xff]  ;;  %v1373_v28 = vld [vmem:[%s2103_s0] sm:$0xff]  ;;  %v154_v30 = vld [vmem:[%s2105_s2 + $0x38] sm:$0xff] }
   0xb   :  { %249 = vmatpush.msra.mxu1 %v160_v17  ;;  %218 = vmatpush.msra.mxu0 %v157_v18  ;;  %v66_v29 = vld [vmem:[%s2104_s1 + $0x20] sm:$0xff]  ;;  %v1384_v31 = vld [vmem:[%s2103_s0 + $0x8] sm:$0xff]  ;;  %v50_v32 = vrot.slane %v1373_v28, 2  ;;  %v51_v33 = vrot.slane %v1373_v28, 4  ;;  %v1391_v34 = vld [vmem:[%s2103_s0 + $0x18] sm:$0xff]  ;;  %v52_v35 = vrot.slane %v1373_v28, 6 }
   0xc   :  { %355 = vmatpush.msra.mxu3 %v71_v19  ;;  %323 = vmatpush.msra.mxu2 %v70_v20  ;;  %vm86_vm4 = vmor %vm84_vm0, %vm85_vm1  ;;  %v65_v36 = vld [vmem:[%s2104_s1 + $0x18] sm:$0xff]  ;;  %v64_v37 = vld [vmem:[%s2104_s1 + $0x10] sm:$0xff]  ;;  %v1145_v38 = vrot.slane %v1373_v28, 9  ;;  %v102_v44 = vrot.slane %v1384_v31, 7  ;;  %v56_v46 = vrot.slane %v1391_v34, 2 }
   0xd   :  { %250 = vmatpush.msra.mxu1 %v158_v21  ;;  %219 = vmatpush.msra.mxu0 %v155_v22  ;;  %vm88_vm5 = vmor %vm86_vm4, %vm87_vm2  ;;  %v93_v39 = vrot.slane %v50_v32, 7  ;;  %v96_v40 = vrot.slane %v51_v33, 7  ;;  %v1411_v41 = vld [vmem:[%s2103_s0 + $0x10] sm:$0xf]  ;;  %v99_v43 = vrot.slane %v52_v35, 7  ;;  %v63_v45 = vld [vmem:[%s2104_s1 + $0x8] sm:$0xff] }
   0xe   :  { %356 = vmatpush.msra.mxu3 %v69_v23  ;;  %324 = vmatpush.msra.mxu2 %v68_v24  ;;  %vm1414_vm6 = vmor %vm88_vm5, %vm89_vm3 }
   0xf   :  { %251 = vmatpush.msra.mxu1 %v156_v26  ;;  %220 = vmatpush.msra.mxu0 %v153_v27  ;;  %v94_v47 = vsel %vm1414_vm6, %v1145_v38, %v93_v39  ;;  %v95_v48 = vrot.slane %v93_v39, 2  ;;  %v98_v49 = vrot.slane %v96_v40, 2 }
  0x10   :  { %357 = vmatpush.msra.mxu3 %v67_v25  ;;  %325 = vmatpush.msra.mxu2 %v66_v29 }
  0x11   :  { %252 = vmatpush.msra.mxu1 %v154_v30 }
  0x12   :  { %17 = vsyncpa [#allocation3], 0  ;;  %358 = vmatpush.msra.mxu3 %v65_v36  ;;  %326 = vmatpush.msra.mxu2 %v64_v37  ;;  %v57_v50 = vrot.slane %v1391_v34, 4  ;;  %v101_v51 = vrot.slane %v99_v43, 2  ;;  %167 = vst [vmem:[#allocation1] ss:$4 sm:$0xff] %v94_v47  ;;  %v97_v52 = vsel %vm1414_vm6, %v95_v48, %v96_v40  ;;  %v100_v53 = vsel %vm1414_vm6, %v98_v49, %v99_v43 }
  0x13   :  { %v114_v54 = vrot.slane %v1411_v41, 7  ;;  %169 = vst [vmem:[#allocation1 + $0x1] ss:$4 sm:$0xff] %v97_v52  ;;  %v1438_v56 = vld [vmem:[%s2103_s0 + $0x20] sm:$0xff]  ;;  %v121_v57 = vrot.slane %v56_v46, 7  ;;  %v58_v58 = vrot.slane %v1391_v34, 6 }
  0x14   :  { %359 = vmatpush.msra.mxu3 %v63_v45  ;;  %v103_v55 = vsel %vm1414_vm6, %v101_v51, %v102_v44  ;;  %171 = vst [vmem:[#allocation1 + $0x2] ss:$4 sm:$0xff] %v100_v53  ;;  %v124_v59 = vrot.slane %v57_v50, 7  ;;  %v53_v60 = vrot.slane %v1384_v31, 2  ;;  %v54_v61 = vrot.slane %v1384_v31, 4  ;;  %v151_v26 = vld [vmem:[%s2105_s2 + $0x20] sm:$0xff] }
  0x15   :  { %173 = vst [vmem:[#allocation1 + $0x3] ss:$4 sm:$0xff] %v103_v55  ;;  %v116_v62 = vrot.slane %v114_v54, 2  ;;  %v1146_v63 = vrot.slane %v1411_v41, 9  ;;  %v55_v0 = vrot.slane %v1384_v31, 6  ;;  %v1147_v1 = vrot.slane %v1391_v34, 9  ;;  %221 = vmatpush.msra.mxu0 %v151_v26 }
  0x16   :  { %v104_v2 = vrot.slane %v102_v44, 2  ;;  %v105_v3 = vrot.slane %v53_v60, 7  ;;  %v61_v4 = vrot.slane %v1438_v56, 6  ;;  %v123_v5 = vrot.slane %v121_v57, 2  ;;  %v1468_v14 = vld [vmem:[%s2103_s0 + $0x28] sm:$0xf] }
  0x17   :  { %v108_v6 = vrot.slane %v54_v61, 7  ;;  %v111_v7 = vrot.slane %v55_v0, 7  ;;  %v126_v8 = vrot.slane %v124_v59, 2  ;;  %v1459_v9 = vrot.slane %v58_v58, 7  ;;  %v152_v27 = vld [vmem:[%s2105_s2 + $0x28] sm:$0xff]  ;;  %v62_v29 = vld [vmem:[%s2104_s1] sm:$0xff] }
  0x18   :  { %v106_v10 = vsel %vm1414_vm6, %v104_v2, %v105_v3  ;;  %v107_v11 = vrot.slane %v105_v3, 2  ;;  %v118_v12 = vsel %vm1414_vm6, %v116_v62, %v1146_v63  ;;  %v122_v15 = vsel %vm1414_vm6, %v1147_v1, %v121_v57  ;;  %253 = vmatpush.msra.mxu1 %v152_v27  ;;  %v149_v36 = vld [vmem:[%s2105_s2 + $0x10] sm:$0xff]  ;;  %v150_v37 = vld [vmem:[%s2105_s2 + $0x18] sm:$0xff]  ;;  %327 = vmatpush.msra.mxu2 %v62_v29  ;;  %v147_v40 = vld [vmem:[%s2105_s2] sm:$0xff]  ;;  %s1224_s30 = smov 128   ;;  %s1225_s12 = smov 8  }
  0x19   :  { %v110_v13 = vrot.slane %v108_v6, 2  ;;  %175 = vst [vmem:[#allocation1 + $0x20] ss:$4 sm:$0xff] %v106_v10  ;;  %v113_v17 = vrot.slane %v111_v7, 2  ;;  %v125_v18 = vsel %vm1414_vm6, %v123_v5, %v124_v59  ;;  %v128_v20 = vsel %vm1414_vm6, %v126_v8, %v1459_v9  ;;  %v148_v43 = vld [vmem:[%s2105_s2 + $0x8] sm:$0xff]  ;;  %222 = vmatpush.msra.mxu0 %v149_v36  ;;  %v426_v49 = vld [vmem:[%s2106_s3 + $0x98] sm:$0xff] }
  0x1a   :  { %v109_v16 = vsel %vm1414_vm6, %v107_v11, %v108_v6  ;;  %v139_v21 = vrot.slane %v61_v4, 7  ;;  %v59_v22 = vrot.slane %v1438_v56, 2  ;;  %v142_v23 = vrot.slane %v1468_v14, 7  ;;  %254 = vmatpush.msra.mxu1 %v150_v37  ;;  %v425_v53 = vld [vmem:[%s2106_s3 + $0x90] sm:$0xff]  ;;  %v424_v57 = vld [vmem:[%s2106_s3 + $0x88] sm:$0xff]  ;;  %v423_v59 = vld [vmem:[%s2106_s3 + $0x80] sm:$0xff] }
  0x1b   :  { %177 = vst [vmem:[#allocation1 + $0x21] ss:$4 sm:$0xff] %v109_v16  ;;  %v60_v24 = vrot.slane %v1438_v56, 4  ;;  %v112_v25 = vsel %vm1414_vm6, %v110_v13, %v111_v7  ;;  %v115_v30 = vsel %vm1414_vm6, %v113_v17, %v114_v54  ;;  %v130_v38 = vrot.slane %v1438_v56, 7  ;;  %223 = vmatpush.msra.mxu0 %v147_v40  ;;  %v422_v3 = vld [vmem:[%s2106_s3 + $0x78] sm:$0xff]  ;;  %v420_v10 = vld [vmem:[%s2106_s3 + $0x68] sm:$0xff] }
  0x1c   :  { %v182_v19 = vld.sshfl [vmem:[#allocation1] sm:$0xff pattern:$0x73625140]  ;;  %v141_v39 = vrot.slane %v139_v21, 2  ;;  %v133_v44 = vrot.slane %v59_v22, 7  ;;  %v144_v45 = vrot.slane %v142_v23, 2  ;;  %255 = vmatpush.msra.mxu1 %v148_v43 }
  0x1d   :  { %184 = vst [vmem:[#allocation1] ss:$4 sm:$0xff] %v118_v12  ;;  %v1148_v47 = vrot.slane %v1468_v14, 9  ;;  %v136_v48 = vrot.slane %v60_v24, 7  ;;  %v129_v51 = vrot.slane %v1459_v9, 2  ;;  %vm197_vm7 = vcmask 654336   ;;  %473 = vmatpush.msrb.mxu0 %v425_v53 }
  0x1e   :  { %185 = vst [vmem:[#allocation1 + $0x1] ss:$4 sm:$0xff] %v122_v15  ;;  %v132_v52 = vrot.slane %v130_v38, 2  ;;  %v143_v54 = vsel %vm1414_vm6, %v141_v39, %v142_v23  ;;  %1149 = vmatmul.msk.f32.vlgmr.msra.gmra.mxu0 %vm197_vm7, %v182_v19  ;;  %1154 = vmatmul.msk.f32.vlgmr.msra.gmra.mxu1 %vm197_vm7, %v182_v19  ;;  %v135_v55 = vrot.slane %v133_v44, 2  ;;  %v421_v9 = vld [vmem:[%s2106_s3 + $0x70] sm:$0xff]  ;;  %v419_v11 = vld [vmem:[%s2106_s3 + $0x60] sm:$0xff] }
  0x1f   :  { %186 = vst [vmem:[#allocation1 + $0x2] ss:$4 sm:$0xff] %v125_v18  ;;  %v146_v62 = vsel %vm1414_vm6, %v144_v45, %v1148_v47  ;;  %505 = vmatpush.msrb.mxu1 %v426_v49  ;;  %v138_v63 = vrot.slane %v136_v48, 2  ;;  %v131_v2 = vsel %vm1414_vm6, %v129_v51, %v130_v38  ;;  %474 = vmatpush.msrb.mxu0 %v423_v59  ;;  %v418_v12 = vld [vmem:[%s2106_s3 + $0x58] sm:$0xff]  ;;  %v411_v16 = vld [vmem:[%s2106_s3 + $0x20] sm:$0xff]  ;;  %v409_v18 = vld [vmem:[%s2106_s3 + $0x10] sm:$0xff] }
  0x20   :  { %187 = vst [vmem:[#allocation1 + $0x3] ss:$4 sm:$0xff] %v128_v20  ;;  %v134_v5 = vsel %vm1414_vm6, %v132_v52, %v133_v44  ;;  %v137_v6 = vsel %vm1414_vm6, %v135_v55, %v136_v48  ;;  %v408_v19 = vld [vmem:[%s2106_s3 + $0x8] sm:$0xff]  ;;  %v407_v20 = vld [vmem:[%s2106_s3] sm:$0xff]  ;;  %vm602_vm8 = vcmask 1041408   ;;  %vm604_vm9 = vcmask 1043458  }
  0x21   :  { %179 = vst [vmem:[#allocation1 + $0x22] ss:$4 sm:$0xff] %v112_v25  ;;  %506 = vmatpush.msrb.mxu1 %v424_v57  ;;  %v140_v8 = vsel %vm1414_vm6, %v138_v63, %v139_v21  ;;  %475 = vmatpush.msrb.mxu0 %v421_v9  ;;  %vm607_vm10 = vcmask 1045508   ;;  %vm610_vm11 = vcmask 1045504   ;;  %vm687_vm12 = vcmask 130048  }
  0x22   :  { %181 = vst [vmem:[#allocation1 + $0x23] ss:$4 sm:$0xff] %v115_v30  ;;  %vm692_vm13 = vcmask 123904  }
  0x23   :  { %507 = vmatpush.msrb.mxu1 %v422_v3  ;;  %476 = vmatpush.msrb.mxu0 %v419_v11 }
  0x25   :  { %508 = vmatpush.msrb.mxu1 %v420_v10 }
  0x27   :  { %v192_v1 = vld.sshfl [vmem:[#allocation1] sm:$0xff pattern:$0x73625140]  ;;  %509 = vmatpush.msrb.mxu1 %v418_v12 }
  0x28   :  { %194 = vst [vmem:[#allocation1] ss:$4 sm:$0xff] %v143_v54 }
  0x29   :  { %195 = vst [vmem:[#allocation1 + $0x1] ss:$4 sm:$0xff] %v146_v62  ;;  %v183_v7 = vld.sshfl [vmem:[#allocation1 + $0x20] sm:$0xff pattern:$0x73625140] }
  0x2a   :  { %188 = vst [vmem:[#allocation1 + $0x20] ss:$4 sm:$0xff] %v131_v2  ;;  %1150 = vmatmul.msk.f32.gmra.mxu0 %vm197_vm7, %v183_v7  ;;  %1155 = vmatmul.msk.f32.gmra.mxu1 %vm197_vm7, %v183_v7  ;;  %v541_v2 = vld [vmem:[%s2107_s4] sm:$0x3]  ;;  %s1131_s4 = sshll.u32 %s2114_s11, 4  ;;  %s1132_s4 = int_to_ptr.hbm [resolvable:$true] %s1131_s4 }
  0x2b   :  { %189 = vst [vmem:[#allocation1 + $0x21] ss:$4 sm:$0xff] %v134_v5  ;;  %v1671_v9 = vperm.slane %v541_v2, 1 }
  0x2c   :  { %190 = vst [vmem:[#allocation1 + $0x22] ss:$4 sm:$0xff] %v137_v6 }
  0x2d   :  { %191 = vst [vmem:[#allocation1 + $0x23] ss:$4 sm:$0xff] %v140_v8  ;;  %v1669_v8 = vperm.slane %v541_v2, 0 }
  0x30   :  { %v196_v13 = vld.sshfl [vmem:[#allocation1] sm:$0xff pattern:$0x73625140] }
  0x31   :  { %272 = vst [vmem:[#allocation1] ss:$4 sm:$0xff] %v1373_v28 }
  0x32   :  { %274 = vst [vmem:[#allocation1 + $0x1] ss:$4 sm:$0xff] %v50_v32  ;;  %1151 = vmatmul.msk.f32.gmra.mxu0 %vm197_vm7, %v192_v1  ;;  %1156 = vmatmul.msk.f32.gmra.mxu1 %vm197_vm7, %v192_v1 }
  0x33   :  { %276 = vst [vmem:[#allocation1 + $0x2] ss:$4 sm:$0xff] %v51_v33 }
  0x34   :  { %278 = vst [vmem:[#allocation1 + $0x3] ss:$4 sm:$0xff] %v52_v35  ;;  %v193_v15 = vld.sshfl [vmem:[#allocation1 + $0x20] sm:$0xff pattern:$0x73625140]  ;;  %v417_v35 = vld [vmem:[%s2106_s3 + $0x50] sm:$0xff] }
  0x35   :  { %280 = vst [vmem:[#allocation1 + $0x20] ss:$4 sm:$0xff] %v1384_v31  ;;  %477 = vmatpush.msrb.mxu0 %v417_v35  ;;  %v783_v35 = vld [vmem:[%s2109_s6 + $0x78] sm:$0xff] }
  0x36   :  { %282 = vst [vmem:[#allocation1 + $0x21] ss:$4 sm:$0xff] %v53_v60  ;;  %829 = vmatpush.msrb.mxu2 %v783_v35  ;;  %v572_v35 = vld [vmem:[%s2112_s9 + $0x28] sm:$0xff] }
  0x37   :  { %284 = vst [vmem:[#allocation1 + $0x22] ss:$4 sm:$0xff] %v54_v61 }
  0x38   :  { %286 = vst [vmem:[#allocation1 + $0x23] ss:$4 sm:$0xff] %v55_v0  ;;  %v413_v0 = vld [vmem:[%s2106_s3 + $0x30] sm:$0xff] }
  0x3a   :  { %1152 = vmatmul.msk.f32.gmra.mxu0 %vm197_vm7, %v193_v15  ;;  %1157 = vmatmul.msk.f32.gmra.mxu1 %vm197_vm7, %v193_v15 }
  0x3b   :  { %v287_v32 = vld.sshfl [vmem:[#allocation1] sm:$0xff pattern:$0x73625140] }
  0x3c   :  { %1164 = vmatmul.msk.f32.vlgmr.msra.gmra.mxu3 %vm197_vm7, %v287_v32  ;;  %289 = vst [vmem:[#allocation1] ss:$4 sm:$0xff] %v1411_v41  ;;  %1159 = vmatmul.msk.f32.vlgmr.msra.gmra.mxu2 %vm197_vm7, %v287_v32 }
  0x3d   :  { %290 = vst [vmem:[#allocation1 + $0x1] ss:$4 sm:$0xff] %v1391_v34 }
  0x3e   :  { %291 = vst [vmem:[#allocation1 + $0x2] ss:$4 sm:$0xff] %v56_v46  ;;  %v416_v46 = vld [vmem:[%s2106_s3 + $0x48] sm:$0xff] }
  0x3f   :  { %292 = vst [vmem:[#allocation1 + $0x3] ss:$4 sm:$0xff] %v57_v50  ;;  %v288_v33 = vld.sshfl [vmem:[#allocation1 + $0x20] sm:$0xff pattern:$0x73625140]  ;;  %510 = vmatpush.msrb.mxu1 %v416_v46 }
  0x40   :  { %293 = vst [vmem:[#allocation1 + $0x20] ss:$4 sm:$0xff] %v58_v58  ;;  %v415_v50 = vld [vmem:[%s2106_s3 + $0x40] sm:$0xff]  ;;  %v414_v58 = vld [vmem:[%s2106_s3 + $0x38] sm:$0xff] }
  0x41   :  { %294 = vst [vmem:[#allocation1 + $0x21] ss:$4 sm:$0xff] %v1438_v56  ;;  %478 = vmatpush.msrb.mxu0 %v415_v50  ;;  %511 = vmatpush.msrb.mxu1 %v414_v58  ;;  %v567_v58 = vld [vmem:[%s2112_s9] sm:$0xff] }
  0x42   :  { %295 = vst [vmem:[#allocation1 + $0x22] ss:$4 sm:$0xff] %v59_v22  ;;  %1158 = vmatmul.msk.f32.gmra.mxu1 %vm197_vm7, %v196_v13  ;;  %1153 = vmatmul.msk.f32.gmra.mxu0 %vm197_vm7, %v196_v13 }
  0x43   :  { %296 = vst [vmem:[#allocation1 + $0x23] ss:$4 sm:$0xff] %v60_v24  ;;  %479 = vmatpush.msrb.mxu0 %v413_v0 }
  0x44   :  { %1165 = vmatmul.msk.f32.gmra.mxu3 %vm197_vm7, %v288_v33  ;;  %1160 = vmatmul.msk.f32.gmra.mxu2 %vm197_vm7, %v288_v33  ;;  %v568_v33 = vld [vmem:[%s2112_s9 + $0x8] sm:$0xff] }
  0x45   :  { %480 = vmatpush.msrb.mxu0 %v411_v16 }
  0x46   :  { %v297_v60 = vld.sshfl [vmem:[#allocation1] sm:$0xff pattern:$0x73625140] }
  0x47   :  { %299 = vst [vmem:[#allocation1] ss:$4 sm:$0xff] %v61_v4  ;;  %v412_v4 = vld [vmem:[%s2106_s3 + $0x28] sm:$0xff]  ;;  %481 = vmatpush.msrb.mxu0 %v409_v18 }
  0x48   :  { %300 = vst [vmem:[#allocation1 + $0x1] ss:$4 sm:$0xff] %v1468_v14  ;;  %512 = vmatpush.msrb.mxu1 %v412_v4 }
  0x49   :  { %482 = vmatpush.msrb.mxu0 %v407_v20  ;;  %v781_v20 = vld [vmem:[%s2109_s6 + $0x68] sm:$0xff] }
  0x4a   :  { %v298_v61 = vld.sshfl [vmem:[#allocation1 + $0x20] sm:$0xff pattern:$0x73625140] }
  0x4b   :  { %377 = vst.sshfl [vmem:[#allocation1 + $0x20] sm:$0xff pattern:$0x73625140] %v1384_v31  ;;  %v410_v31 = vld [vmem:[%s2106_s3 + $0x18] sm:$0xff] }
  0x4c   :  { %1166 = vmatmul.msk.f32.gmra.mxu3 %vm197_vm7, %v297_v60  ;;  %1161 = vmatmul.msk.f32.gmra.mxu2 %vm197_vm7, %v297_v60  ;;  %v782_v60 = vld [vmem:[%s2109_s6 + $0x70] sm:$0xff] }
  0x4d   :  { %513 = vmatpush.msrb.mxu1 %v410_v31  ;;  %830 = vmatpush.msrb.mxu2 %v782_v60 }
  0x4f   :  { %v301_v17 = vld.sshfl [vmem:[#allocation1] sm:$0xff pattern:$0x73625140]  ;;  %514 = vmatpush.msrb.mxu1 %v408_v19  ;;  %v785_v19 = vld [vmem:[%s2109_s6 + $0x88] sm:$0xff]  ;;  %831 = vmatpush.msrb.mxu2 %v781_v20 }
  0x50   :  { %376 = vst.sshfl [vmem:[#allocation1] sm:$0xff pattern:$0x73625140] %v1373_v28  ;;  %872 = vmatpush.msrb.mxu3 %v785_v19 }
  0x52   :  { %v385_v21 = vld [vmem:[#allocation1 + $0x20] ss:$4 sm:$0xff]  ;;  %v387_v22 = vld [vmem:[#allocation1 + $0x21] ss:$4 sm:$0xff]  ;;  %v389_v23 = vld [vmem:[#allocation1 + $0x22] ss:$4 sm:$0xff] }
  0x53   :  { %v391_v24 = vld [vmem:[#allocation1 + $0x23] ss:$4 sm:$0xff] }
  0x54   :  { %1167 = vmatmul.msk.f32.gmra.mxu3 %vm197_vm7, %v298_v61  ;;  %395 = vst.sshfl [vmem:[#allocation1 + $0x20] sm:$0xff pattern:$0x73625140] %v1391_v34  ;;  %1162 = vmatmul.msk.f32.gmra.mxu2 %vm197_vm7, %v298_v61 }
  0x57   :  { %v379_v28 = vld [vmem:[#allocation1 + $0x1] ss:$4 sm:$0xff]  ;;  %v381_v25 = vld [vmem:[#allocation1 + $0x2] ss:$4 sm:$0xff]  ;;  %v383_v26 = vld [vmem:[#allocation1 + $0x3] ss:$4 sm:$0xff] }
  0x58   :  { %392 = vst.sshfl [vmem:[#allocation1] sm:$0xff pattern:$0x73625140] %v1411_v41 }
  0x5b   :  { %v396_v27 = vld [vmem:[#allocation1 + $0x21] ss:$4 sm:$0xff]  ;;  %v397_v29 = vld [vmem:[#allocation1 + $0x22] ss:$4 sm:$0xff]  ;;  %v398_v30 = vld [vmem:[#allocation1 + $0x23] ss:$4 sm:$0xff] }
  0x5c   :  { %400 = vst.sshfl [vmem:[#allocation1 + $0x20] sm:$0xff pattern:$0x73625140] %v1468_v14  ;;  %1168 = vmatmul.msk.f32.gmra.mxu3 %vm197_vm7, %v301_v17  ;;  %1163 = vmatmul.msk.f32.gmra.mxu2 %vm197_vm7, %v301_v17 }
  0x5d   :  { %439 = vst [vmem:[#allocation1 + $0x22] ss:$4 sm:$0xff] %v391_v24 }
  0x5f   :  { %v393_v36 = vld [vmem:[#allocation1] ss:$4 sm:$0xff]  ;;  %v394_v37 = vld [vmem:[#allocation1 + $0x1] ss:$4 sm:$0xff] }
  0x60   :  { %399 = vst.sshfl [vmem:[#allocation1] sm:$0xff pattern:$0x73625140] %v1438_v56 }
  0x61   :  { %441 = vst [vmem:[#allocation1 + $0x23] ss:$4 sm:$0xff] %v393_v36 }
  0x63   :  { %v405_v34 = vld [vmem:[#allocation1 + $0x20] ss:$4 sm:$0xff]  ;;  %v406_v38 = vld [vmem:[#allocation1 + $0x21] ss:$4 sm:$0xff] }
  0x64   :  { %435 = vst [vmem:[#allocation1 + $0x20] ss:$4 sm:$0xff] %v387_v22 }
  0x65   :  { %437 = vst [vmem:[#allocation1 + $0x21] ss:$4 sm:$0xff] %v389_v23 }
  0x67   :  { %v401_v41 = vld [vmem:[#allocation1] ss:$4 sm:$0xff]  ;;  %v402_v39 = vld [vmem:[#allocation1 + $0x1] ss:$4 sm:$0xff]  ;;  %v403_v40 = vld [vmem:[#allocation1 + $0x2] ss:$4 sm:$0xff] }
  0x68   :  { %v404_v43 = vld [vmem:[#allocation1 + $0x3] ss:$4 sm:$0xff]  ;;  %427 = vst [vmem:[#allocation1] ss:$4 sm:$0xff] %v379_v28 }
  0x69   :  { %429 = vst [vmem:[#allocation1 + $0x1] ss:$4 sm:$0xff] %v381_v25  ;;  %v780_v28 = vld [vmem:[%s2109_s6 + $0x60] sm:$0xff] }
  0x6a   :  { %431 = vst [vmem:[#allocation1 + $0x2] ss:$4 sm:$0xff] %v383_v26  ;;  %832 = vmatpush.msrb.mxu2 %v780_v28 }
  0x6b   :  { %433 = vst [vmem:[#allocation1 + $0x3] ss:$4 sm:$0xff] %v385_v21 }
  0x6c   :  { %v443_v14 = vld.sshfl [vmem:[#allocation1 + $0x20] sm:$0xff pattern:$0x73625140] }
  0x6d   :  { %448 = vst [vmem:[#allocation1 + $0x20] ss:$4 sm:$0xff] %v401_v41  ;;  %v779_v41 = vld [vmem:[%s2109_s6 + $0x58] sm:$0xff] }
  0x6e   :  { %449 = vst [vmem:[#allocation1 + $0x21] ss:$4 sm:$0xff] %v402_v39  ;;  %v570_v39 = vld [vmem:[%s2112_s9 + $0x18] sm:$0xff]  ;;  %833 = vmatpush.msrb.mxu2 %v779_v41 }
  0x6f   :  { %450 = vst [vmem:[#allocation1 + $0x22] ss:$4 sm:$0xff] %v403_v40 }
  0x70   :  { %451 = vst [vmem:[#allocation1 + $0x23] ss:$4 sm:$0xff] %v404_v43 }
  0x72   :  { %v442_v44 = vld.sshfl [vmem:[#allocation1] sm:$0xff pattern:$0x73625140] }
  0x73   :  { %444 = vst [vmem:[#allocation1] ss:$4 sm:$0xff] %v394_v37  ;;  %1169 = vmatmul.msk.f32.vlgmr.msrb.gmra.mxu0 %vm197_vm7, %v442_v44  ;;  %1174 = vmatmul.msk.f32.vlgmr.msrb.gmra.mxu1 %vm197_vm7, %v442_v44 }
  0x74   :  { %445 = vst [vmem:[#allocation1 + $0x1] ss:$4 sm:$0xff] %v396_v27 }
  0x75   :  { %446 = vst [vmem:[#allocation1 + $0x2] ss:$4 sm:$0xff] %v397_v29 }
  0x76   :  { %447 = vst [vmem:[#allocation1 + $0x3] ss:$4 sm:$0xff] %v398_v30 }
  0x77   :  { %v453_v45 = vld.sshfl [vmem:[#allocation1 + $0x20] sm:$0xff pattern:$0x73625140] }
  0x7b   :  { %1170 = vmatmul.msk.f32.gmra.mxu0 %vm197_vm7, %v443_v14  ;;  %1175 = vmatmul.msk.f32.gmra.mxu1 %vm197_vm7, %v443_v14 }
  0x7d   :  { %v452_v56 = vld.sshfl [vmem:[#allocation1] sm:$0xff pattern:$0x73625140] }
  0x7e   :  { %454 = vst [vmem:[#allocation1] ss:$4 sm:$0xff] %v405_v34 }
  0x7f   :  { %455 = vst [vmem:[#allocation1 + $0x1] ss:$4 sm:$0xff] %v406_v38 }
  0x83   :  { %1171 = vmatmul.msk.f32.gmra.mxu0 %vm197_vm7, %v452_v56  ;;  %1176 = vmatmul.msk.f32.gmra.mxu1 %vm197_vm7, %v452_v56  ;;  %v569_v56 = vld [vmem:[%s2112_s9 + $0x10] sm:$0xff] }
  0x86   :  { %v456_v47 = vld.sshfl [vmem:[#allocation1] sm:$0xff pattern:$0x73625140] }
  0x8b   :  { %1172 = vmatmul.msk.f32.gmra.mxu0 %vm197_vm7, %v453_v45  ;;  %1177 = vmatmul.msk.f32.gmra.mxu1 %vm197_vm7, %v453_v45 }
  0x93   :  { %1173 = vmatmul.msk.f32.gmra.mxu0 %vm197_vm7, %v456_v47  ;;  %1178 = vmatmul.msk.f32.gmra.mxu1 %vm197_vm7, %v456_v47 }
  0x9b   :  { %v225_v48 = vpop.f32.mrf.mxu0  ;;  %v257_v49 = vpop.f32.mrf.mxu1 }
  0xa7   :  { %v228_v51 = vpop.f32.mrf.mxu0  ;;  %v260_v52 = vpop.f32.mrf.mxu1 }
  0xaf   :  { %v1654_v53 = vpop.f32.mrf.mxu0  ;;  %v1656_v54 = vpop.f32.mrf.mxu1 }
  0xb7   :  { %v1658_v55 = vpop.f32.mrf.mxu0  ;;  %v1660_v57 = vpop.f32.mrf.mxu1 }
  0xbf   :  { %v361_v59 = vpop.f32.mrf.mxu3  ;;  %v329_v62 = vpop.f32.mrf.mxu2 }
  0xc0   :  { %v1662_v63 = vpop.f32.mrf.mxu0  ;;  %v1664_v1 = vpop.f32.mrf.mxu1  ;;  %v362_v6 = vadd.f32 %v361_v59, %v257_v49  ;;  %v330_v7 = vadd.f32 %v329_v62, %v225_v48 }
  0xc7   :  { %v364_v3 = vpop.f32.mrf.mxu3  ;;  %v332_v5 = vpop.f32.mrf.mxu2 }
  0xc8   :  { %v365_v61 = vadd.f32 %v364_v3, %v260_v52  ;;  %v333_v0 = vadd.f32 %v332_v5, %v228_v51 }
  0xcf   :  { %v367_v4 = vpop.f32.mrf.mxu3  ;;  %v335_v16 = vpop.f32.mrf.mxu2 }
  0xd0   :  { %v368_v40 = vadd.f32 %v367_v4, %v1656_v54  ;;  %v336_v43 = vadd.f32 %v335_v16, %v1654_v53 }
  0xd7   :  { %v370_v48 = vpop.f32.mrf.mxu3  ;;  %v338_v49 = vpop.f32.mrf.mxu2 }
  0xdf   :  { %v373_v16 = vpop.f32.mrf.mxu3 }
  0xf0   :  { %v484_v10 = vpop.f32.mrf.mxu0  ;;  %v516_v11 = vpop.f32.mrf.mxu1 }
  0xf1   :  { %v531_v12 = vadd.f32 %v484_v10, %v330_v7  ;;  %v532_v13 = vadd.f32 %v516_v11, %v362_v6 }
  0xf3   :  { %v547_v15 = vadd.f32 %v1669_v8, %v531_v12  ;;  %v548_v32 = vadd.f32 %v1671_v9, %v532_v13  ;;  %v339_v12 = vadd.f32 %v338_v49, %v1658_v55  ;;  %v778_v55 = vld [vmem:[%s2109_s6 + $0x50] sm:$0xff]  ;;  %v773_v49 = vld [vmem:[%s2109_s6 + $0x28] sm:$0xff] }
  0xf4   :  { %834 = vmatpush.msrb.mxu2 %v778_v55 }
  0xf5   :  { %v557_v46 = vmax.f32 %v547_v15, 0.0  ;;  %v558_v50 = vmax.f32 %v548_v32, 0.0  ;;  %v371_v32 = vadd.f32 %v370_v48, %v1660_v57 }
  0xf7   :  { %v578_v17 = vmul.f32 %v568_v33, %v558_v50  ;;  %v577_v21 = vmul.f32 %v567_v58, %v557_v46 }
  0xf8   :  { %v487_v31 = vpop.f32.mrf.mxu0  ;;  %v519_v18 = vpop.f32.mrf.mxu1 }
  0xf9   :  { %v597_v22 = vrot.slane %v578_v17, 6  ;;  %v533_v23 = vadd.f32 %v487_v31, %v333_v0  ;;  %v534_v24 = vadd.f32 %v519_v18, %v365_v61  ;;  %v777_v61 = vld [vmem:[%s2109_s6 + $0x48] sm:$0xff]  ;;  %v571_v0 = vld [vmem:[%s2112_s9 + $0x20] sm:$0xff]  ;;  %v341_v17 = vpop.f32.mrf.mxu2 }
  0xfa   :  { %835 = vmatpush.msrb.mxu2 %v777_v61  ;;  %v776_v18 = vld [vmem:[%s2109_s6 + $0x40] sm:$0xff]  ;;  %v342_v28 = vadd.f32 %v341_v17, %v1662_v63 }
  0xfb   :  { %v1697_v25 = vsel %vm602_vm8, %v577_v21, %v597_v22  ;;  %v605_v26 = vsel %vm604_vm9, %v577_v21, %v597_v22  ;;  %v608_v27 = vsel %vm607_vm10, %v577_v21, %v597_v22  ;;  %v611_v29 = vsel %vm610_vm11, %v597_v22, %v577_v21 }
  0xfc   :  { %v1702_v30 = vrot.slane %v605_v26, 2  ;;  %v1704_v36 = vrot.slane %v608_v27, 4  ;;  %v1706_v37 = vrot.slane %v611_v29, 6  ;;  %637 = vst [vmem:[#allocation1] ss:$4 sm:$0xff] %v1697_v25  ;;  %v549_v34 = vadd.f32 %v1669_v8, %v533_v23  ;;  %836 = vmatpush.msrb.mxu2 %v776_v18  ;;  %v775_v23 = vld [vmem:[%s2109_s6 + $0x38] sm:$0xff] }
  0xfd   :  { %v550_v38 = vadd.f32 %v1671_v9, %v534_v24  ;;  %v374_v24 = vadd.f32 %v373_v16, %v1664_v1  ;;  %v574_v27 = vld [vmem:[%s2112_s9 + $0x38] sm:$0xff]  ;;  %v774_v1 = vld [vmem:[%s2109_s6 + $0x30] sm:$0xff] }
  0xfe   :  { %639 = vst [vmem:[#allocation1 + $0x1] ss:$4 sm:$0xff] %v1702_v30  ;;  %v559_v14 = vmax.f32 %v549_v34, 0.0  ;;  %837 = vmatpush.msrb.mxu2 %v775_v23  ;;  %v1003_v23 = vld [vmem:[%s2110_s7 + $0x78] sm:$0xff] }
  0xff   :  { %641 = vst [vmem:[#allocation1 + $0x2] ss:$4 sm:$0xff] %v1704_v36  ;;  %v560_v44 = vmax.f32 %v550_v38, 0.0  ;;  %1049 = vmatpush.msra.mxu0 %v1003_v23 }
 0x100   :  { %643 = vst [vmem:[#allocation1 + $0x3] ss:$4 sm:$0xff] %v1706_v37  ;;  %v490_v45 = vpop.f32.mrf.mxu0  ;;  %v522_v47 = vpop.f32.mrf.mxu1  ;;  %v579_v54 = vmul.f32 %v569_v56, %v559_v14  ;;  %v573_v56 = vld [vmem:[%s2112_s9 + $0x30] sm:$0xff]  ;;  %838 = vmatpush.msrb.mxu2 %v774_v1 }
 0x101   :  { %v580_v51 = vmul.f32 %v570_v39, %v560_v44  ;;  %v535_v52 = vadd.f32 %v490_v45, %v336_v43  ;;  %v536_v59 = vadd.f32 %v522_v47, %v368_v40 }
 0x102   :  { %839 = vmatpush.msrb.mxu2 %v773_v49 }
 0x103   :  { %v598_v62 = vrot.slane %v580_v51, 6  ;;  %v551_v53 = vadd.f32 %v1669_v8, %v535_v52  ;;  %v552_v2 = vadd.f32 %v1671_v9, %v536_v59 }
 0x105   :  { %v1728_v3 = vsel %vm602_vm8, %v579_v54, %v598_v62  ;;  %v614_v5 = vsel %vm604_vm9, %v579_v54, %v598_v62  ;;  %v616_v6 = vsel %vm607_vm10, %v579_v54, %v598_v62  ;;  %v618_v7 = vsel %vm610_vm11, %v598_v62, %v579_v54  ;;  %v772_v54 = vld [vmem:[%s2109_s6 + $0x20] sm:$0xff] }
 0x106   :  { %v1733_v10 = vrot.slane %v614_v5, 2  ;;  %v1735_v11 = vrot.slane %v616_v6, 4  ;;  %645 = vst [vmem:[#allocation1 + $0x20] ss:$4 sm:$0xff] %v1728_v3  ;;  %v1739_v15 = vrot.slane %v618_v7, 6  ;;  %v561_v58 = vmax.f32 %v551_v53, 0.0  ;;  %840 = vmatpush.msrb.mxu2 %v772_v54 }
 0x107   :  { %v652_v13 = vld.sshfl [vmem:[#allocation1] sm:$0xff pattern:$0x73625140]  ;;  %v653_v33 = vld.sshfl [vmem:[#allocation1 + $0x8] sm:$0xff pattern:$0x73625140] }
 0x108   :  { %686 = vst [vmem:[%s2113_s10] sm:$0xff] %v652_v13  ;;  %v493_v46 = vpop.f32.mrf.mxu0  ;;  %v525_v50 = vpop.f32.mrf.mxu1  ;;  %v562_v60 = vmax.f32 %v552_v2, 0.0  ;;  %v581_v21 = vmul.f32 %v571_v0, %v561_v58  ;;  %v771_v5 = vld [vmem:[%s2109_s6 + $0x18] sm:$0xff]  ;;  %v784_v0 = vld [vmem:[%s2109_s6 + $0x80] sm:$0xff]  ;;  %v729_v1 = vrot.slane %v1728_v3, 7 }
 0x109   :  { %647 = vst [vmem:[#allocation1 + $0x21] ss:$4 sm:$0xff] %v1733_v10  ;;  %v537_v57 = vadd.f32 %v493_v46, %v339_v12  ;;  %v538_v4 = vadd.f32 %v525_v50, %v371_v32  ;;  %841 = vmatpush.msrb.mxu2 %v771_v5  ;;  %v770_v50 = vld [vmem:[%s2109_s6 + $0x10] sm:$0xff]  ;;  %873 = vmatpush.msrb.mxu3 %v784_v0 }
 0x10a   :  { %649 = vst [vmem:[#allocation1 + $0x22] ss:$4 sm:$0xff] %v1735_v11  ;;  %v582_v31 = vmul.f32 %v572_v35, %v562_v60  ;;  %v769_v60 = vld [vmem:[%s2109_s6 + $0x8] sm:$0xff]  ;;  %v731_v49 = vrot.slane %v729_v1, 2 }
 0x10b   :  { %651 = vst [vmem:[#allocation1 + $0x23] ss:$4 sm:$0xff] %v1739_v15  ;;  %v553_v19 = vadd.f32 %v1669_v8, %v537_v57  ;;  %v554_v20 = vadd.f32 %v1671_v9, %v538_v4  ;;  %842 = vmatpush.msrb.mxu2 %v770_v50  ;;  %v575_v57 = vld [vmem:[%s2112_s9 + $0x40] sm:$0xf] }
 0x10c   :  { %688 = vst.msk [vmem:[%s2113_s10 + $0x8] sm:$0xff] %vm687_vm12, %v653_v33  ;;  %v599_v22 = vrot.slane %v582_v31, 6  ;;  %v768_v4 = vld [vmem:[%s2109_s6] sm:$0xff] }
 0x10d   :  { %v564_v26 = vmax.f32 %v554_v20, 0.0  ;;  %v563_v40 = vmax.f32 %v553_v19, 0.0  ;;  %843 = vmatpush.msrb.mxu2 %v769_v60 }
 0x10e   :  { %v1778_v29 = vsel %vm602_vm8, %v581_v21, %v599_v22  ;;  %v621_v34 = vsel %vm604_vm9, %v581_v21, %v599_v22  ;;  %v623_v38 = vsel %vm607_vm10, %v581_v21, %v599_v22  ;;  %v625_v41 = vsel %vm610_vm11, %v599_v22, %v581_v21  ;;  %v715_v22 = vld [vmem:[%s2108_s5 + $0x78] sm:$0xff] }
 0x10f   :  { %v1786_v63 = vrot.slane %v621_v34, 2  ;;  %v1788_v39 = vrot.slane %v623_v38, 4  ;;  %656 = vst [vmem:[#allocation1] ss:$4 sm:$0xff] %v1778_v29  ;;  %v1791_v44 = vrot.slane %v625_v41, 6  ;;  %v584_v45 = vmul.f32 %v574_v27, %v564_v26  ;;  %844 = vmatpush.msrb.mxu2 %v768_v4  ;;  %v717_v26 = vld [vmem:[%s2108_s5 + $0x88] sm:$0xff] }
 0x110   :  { %v496_v43 = vpop.f32.mrf.mxu0  ;;  %v528_v14 = vpop.f32.mrf.mxu1  ;;  %v583_v62 = vmul.f32 %v573_v56, %v563_v40  ;;  %v1002_v27 = vld [vmem:[%s2110_s7 + $0x70] sm:$0xff]  ;;  %973 = vmatpush.msra.mxu3 %v717_v26  ;;  %v713_v34 = vld [vmem:[%s2108_s5 + $0x68] sm:$0xff]  ;;  %v726_v41 = vrot.slane %v1706_v37, 7  ;;  %v732_v40 = vrot.slane %v1733_v10, 7  ;;  %v720_v56 = vrot.slane %v1702_v30, 7  ;;  %v707_v4 = vld [vmem:[%s2108_s5 + $0x38] sm:$0xff] }
 0x111   :  { %v539_v47 = vadd.f32 %v496_v43, %v342_v28  ;;  %v540_v48 = vadd.f32 %v528_v14, %v374_v24  ;;  %v600_v59 = vrot.slane %v584_v45, 6  ;;  %v1005_v24 = vld [vmem:[%s2110_s7 + $0x88] sm:$0xff]  ;;  %930 = vmatpush.msra.mxu2 %v715_v22  ;;  %v714_v28 = vld [vmem:[%s2108_s5 + $0x70] sm:$0xff]  ;;  %1050 = vmatpush.msra.mxu0 %v1002_v27  ;;  %v712_v43 = vld [vmem:[%s2108_s5 + $0x60] sm:$0xff]  ;;  %v741_v50 = vrot.slane %v1778_v29, 7 }
 0x112   :  { %v654_v51 = vld.sshfl [vmem:[#allocation1 + $0x20] sm:$0xff pattern:$0x73625140]  ;;  %v655_v52 = vld.sshfl [vmem:[#allocation1 + $0x28] sm:$0xff pattern:$0x73625140]  ;;  %1092 = vmatpush.msra.mxu1 %v1005_v24 }
 0x113   :  { %689 = vst [vmem:[%s2113_s10 + $0x10] sm:$0xff] %v654_v51  ;;  %v555_v53 = vadd.f32 %v1669_v8, %v539_v47  ;;  %v556_v2 = vadd.f32 %v1671_v9, %v540_v48  ;;  %v1814_v6 = vsel %vm602_vm8, %v583_v62, %v600_v59  ;;  %v628_v7 = vsel %vm604_vm9, %v583_v62, %v600_v59  ;;  %v576_v8 = vld [vmem:[%s2112_s9 + $0x48] sm:$0xf]  ;;  %v1000_v14 = vld [vmem:[%s2110_s7 + $0x60] sm:$0xff]  ;;  %v711_v45 = vld [vmem:[%s2108_s5 + $0x58] sm:$0xff] }
 0x114   :  { %659 = vst [vmem:[#allocation1 + $0x20] ss:$4 sm:$0xff] %v1786_v63  ;;  %v630_v12 = vsel %vm607_vm10, %v583_v62, %v600_v59  ;;  %v632_v13 = vsel %vm610_vm11, %v600_v59, %v583_v62  ;;  %v1825_v33 = vrot.slane %v628_v7, 2  ;;  %v1001_v38 = vld [vmem:[%s2110_s7 + $0x68] sm:$0xff]  ;;  %931 = vmatpush.msra.mxu2 %v714_v28  ;;  %v999_v47 = vld [vmem:[%s2110_s7 + $0x58] sm:$0xff]  ;;  %v728_v48 = vrot.slane %v726_v41, 2 }
 0x115   :  { %660 = vst [vmem:[#allocation1 + $0x21] ss:$4 sm:$0xff] %v1788_v39  ;;  %v1827_v35 = vrot.slane %v630_v12, 4  ;;  %v1829_v46 = vrot.slane %v632_v13, 6  ;;  %v565_v55 = vmax.f32 %v555_v53, 0.0  ;;  %v566_v58 = vmax.f32 %v556_v2, 0.0  ;;  %1051 = vmatpush.msra.mxu0 %v1001_v38 }
 0x116   :  { %661 = vst [vmem:[#allocation1 + $0x22] ss:$4 sm:$0xff] %v1791_v44  ;;  %v657_v9 = vld.sshfl [vmem:[#allocation1] sm:$0xff pattern:$0x73625140]  ;;  %932 = vmatpush.msra.mxu2 %v713_v34  ;;  %v735_v51 = vrot.slane %v1735_v11, 7 }
 0x117   :  { %v658_v32 = vld.sshfl [vmem:[#allocation1 + $0x8] sm:$0xff pattern:$0x73625140]  ;;  %691 = vst [vmem:[%s2113_s10 + $0x20] sm:$0x3] %v657_v9  ;;  %v586_v61 = vmul.f32 %v576_v8, %v566_v58  ;;  %v585_v16 = vmul.f32 %v575_v57, %v565_v55  ;;  %1052 = vmatpush.msra.mxu0 %v1000_v14  ;;  %v734_v59 = vrot.slane %v732_v40, 2  ;;  %v733_v57 = vsel %vm1414_vm6, %v731_v49, %v732_v40 }
 0x118   :  { %662 = vst [vmem:[#allocation1 + $0x23] ss:$4 sm:$0xff] %v1814_v6  ;;  %933 = vmatpush.msra.mxu2 %v712_v43  ;;  %v710_v62 = vld [vmem:[%s2108_s5 + $0x50] sm:$0xff]  ;;  %v709_v12 = vld [vmem:[%s2108_s5 + $0x48] sm:$0xff]  ;;  %v723_v8 = vrot.slane %v1704_v36, 7  ;;  %v737_v9 = vrot.slane %v735_v51, 2 }
 0x119   :  { %665 = vst [vmem:[#allocation1] ss:$4 sm:$0xff] %v1825_v33  ;;  %v601_v17 = vrot.slane %v586_v61, 6  ;;  %v998_v53 = vld [vmem:[%s2110_s7 + $0x50] sm:$0xff]  ;;  %1053 = vmatpush.msra.mxu0 %v999_v47  ;;  %v997_v13 = vld [vmem:[%s2110_s7 + $0x48] sm:$0xff]  ;;  %v708_v55 = vld [vmem:[%s2108_s5 + $0x40] sm:$0xff]  ;;  %v736_v61 = vsel %vm1414_vm6, %v734_v59, %v735_v51 }
 0x11a   :  { %666 = vst [vmem:[#allocation1 + $0x1] ss:$4 sm:$0xff] %v1827_v35  ;;  %934 = vmatpush.msra.mxu2 %v711_v45  ;;  %v996_v58 = vld [vmem:[%s2110_s7 + $0x40] sm:$0xff]  ;;  %v722_v60 = vrot.slane %v720_v56, 2  ;;  %v706_v24 = vld [vmem:[%s2108_s5 + $0x30] sm:$0xff]  ;;  %v754_v38 = vrot.slane %v1825_v33, 7 }
 0x11b   :  { %667 = vst [vmem:[#allocation1 + $0x2] ss:$4 sm:$0xff] %v1829_v46  ;;  %v1859_v31 = vsel %vm602_vm8, %v585_v16, %v601_v17  ;;  %v635_v18 = vsel %vm604_vm9, %v585_v16, %v601_v17  ;;  %1054 = vmatpush.msra.mxu0 %v998_v53  ;;  %v995_v16 = vld [vmem:[%s2110_s7 + $0x38] sm:$0xff]  ;;  %v716_v17 = vld [vmem:[%s2108_s5 + $0x80] sm:$0xff]  ;;  %v994_v28 = vld [vmem:[%s2110_s7 + $0x30] sm:$0xff] }
 0x11c   :  { %693 = vst.msk [vmem:[%s2113_s10 + $0x28] sm:$0x3] %vm692_vm13, %v658_v32  ;;  %v1865_v21 = vrot.slane %v635_v18, 2  ;;  %935 = vmatpush.msra.mxu2 %v710_v62  ;;  %v730_v32 = vsel %vm1414_vm6, %v728_v48, %v729_v1  ;;  %v1179_v18 = vrot.slane %v1697_v25, 9  ;;  %v1004_v22 = vld [vmem:[%s2110_s7 + $0x80] sm:$0xff]  ;;  %974 = vmatpush.msra.mxu3 %v716_v17  ;;  %v763_v27 = vrot.slane %v1859_v31, 7 }
 0x11d   :  { %690 = vst.msk [vmem:[%s2113_s10 + $0x18] sm:$0xff] %vm687_vm12, %v655_v52  ;;  %v738_v52 = vrot.slane %v1739_v15, 7  ;;  %1055 = vmatpush.msra.mxu0 %v997_v13  ;;  %1093 = vmatpush.msra.mxu1 %v1004_v22  ;;  %v724_v34 = vsel %vm1414_vm6, %v722_v60, %v723_v8  ;;  %v760_v1 = vrot.slane %v1829_v46, 7  ;;  %v705_v40 = vld [vmem:[%s2108_s5 + $0x28] sm:$0xff]  ;;  %v704_v45 = vld [vmem:[%s2108_s5 + $0x20] sm:$0xff]  ;;  %v745_v48 = vrot.slane %v1788_v39, 7 }
 0x11e   :  { %668 = vst [vmem:[#allocation1 + $0x3] ss:$4 sm:$0xff] %v1859_v31  ;;  %936 = vmatpush.msra.mxu2 %v709_v12  ;;  %v721_v26 = vsel %vm1414_vm6, %v1179_v18, %v720_v56  ;;  %v993_v43 = vld [vmem:[%s2110_s7 + $0x28] sm:$0xff]  ;;  %v757_v56 = vrot.slane %v1827_v35, 7  ;;  %v992_v47 = vld [vmem:[%s2110_s7 + $0x20] sm:$0xff]  ;;  %v765_v49 = vrot.slane %v763_v27, 2 }
 0x11f   :  { %v663_v19 = vld.sshfl [vmem:[#allocation1 + $0x20] sm:$0xff pattern:$0x73625140]  ;;  %v664_v20 = vld.sshfl [vmem:[#allocation1 + $0x28] sm:$0xff pattern:$0x73625140]  ;;  %1056 = vmatpush.msra.mxu0 %v996_v58 }
 0x120   :  { %694 = vst [vmem:[%s2113_s10 + $0x30] sm:$0xff] %v663_v19  ;;  %v740_v0 = vrot.slane %v738_v52, 2  ;;  %v725_v19 = vrot.slane %v723_v8, 2  ;;  %937 = vmatpush.msra.mxu2 %v708_v55  ;;  %v766_v51 = vrot.slane %v1865_v21, 7  ;;  %v756_v59 = vrot.slane %v754_v38, 2  ;;  %v703_v62 = vld [vmem:[%s2108_s5 + $0x18] sm:$0xff] }
 0x121   :  { %669 = vst [vmem:[#allocation1 + $0x20] ss:$4 sm:$0xff] %v1865_v21  ;;  %1057 = vmatpush.msra.mxu0 %v995_v16  ;;  %v991_v53 = vld [vmem:[%s2110_s7 + $0x18] sm:$0xff]  ;;  %v990_v12 = vld [vmem:[%s2110_s7 + $0x10] sm:$0xff]  ;;  %v700_v18 = vld [vmem:[%s2108_s5] sm:$0xff] }
 0x122   :  { %695 = vst.msk [vmem:[%s2113_s10 + $0x38] sm:$0xff] %vm687_vm12, %v664_v20  ;;  %v739_v20 = vsel %vm1414_vm6, %v737_v9, %v738_v52  ;;  %v742_v23 = vsel %vm1414_vm6, %v740_v0, %v741_v50  ;;  %938 = vmatpush.msra.mxu2 %v707_v4  ;;  %v727_v14 = vsel %vm1414_vm6, %v725_v19, %v726_v41  ;;  %v748_v41 = vrot.slane %v1791_v44, 7  ;;  %v989_v4 = vld [vmem:[%s2110_s7 + $0x8] sm:$0xff] }
 0x123   :  { %1058 = vmatpush.msra.mxu0 %v994_v28  ;;  %v751_v52 = vrot.slane %v1814_v6, 7  ;;  %v767_v50 = vsel %vm1414_vm6, %v765_v49, %v766_v51  ;;  %v758_v60 = vsel %vm1414_vm6, %v756_v59, %v757_v56  ;;  %v1196_v59 = vld [vmem:[%s2111_s8] ss:$0 sm:$0xff]  ;;  %s1223_s8 = smov [#allocation2]  }
 0x124   :  { %939 = vmatpush.msra.mxu2 %v706_v24  ;;  %v750_v55 = vrot.slane %v748_v41, 2  ;;  %s1129_s28 = sshll.u32 %s1223_s8, 4  ;;  %s1130_s28 = int_to_ptr.vmem [resolvable:$true] %s1129_s28 }
 0x125   :  { %v670_v54 = vld.sshfl [vmem:[#allocation1] sm:$0xff pattern:$0x73625140]  ;;  %v671_v7 = vld.sshfl [vmem:[#allocation1 + $0x8] sm:$0xff pattern:$0x73625140]  ;;  %1059 = vmatpush.msra.mxu0 %v993_v43 }
 0x126   :  { %696 = vst [vmem:[%s2113_s10 + $0x40] sm:$0xff] %v670_v54  ;;  %940 = vmatpush.msra.mxu2 %v705_v40  ;;  %v762_v54 = vrot.slane %v760_v1, 2  ;;  %v753_v58 = vrot.slane %v751_v52, 2  ;;  %v752_v22 = vsel %vm1414_vm6, %v750_v55, %v751_v52 }
 0x127   :  { %792 = vst [vmem:[#allocation1 + $0x3] ss:$4 sm:$0xff] %v730_v32  ;;  %1060 = vmatpush.msra.mxu0 %v992_v47  ;;  %v747_v32 = vrot.slane %v745_v48, 2 }
 0x128   :  { %v672_v2 = vld.sshfl [vmem:[#allocation1 + $0x20] sm:$0xff pattern:$0x73625140]  ;;  %v673_v5 = vld.sshfl [vmem:[#allocation1 + $0x28] sm:$0xff pattern:$0x73625140]  ;;  %941 = vmatpush.msra.mxu2 %v704_v45  ;;  %v764_v13 = vsel %vm1414_vm6, %v762_v54, %v763_v27 }
 0x129   :  { %698 = vst [vmem:[%s2113_s10 + $0x50] sm:$0x3] %v672_v2  ;;  %v1180_v2 = vrot.slane %v1786_v63, 9  ;;  %1061 = vmatpush.msra.mxu0 %v991_v53  ;;  %v749_v19 = vsel %vm1414_vm6, %v747_v32, %v748_v41 }
 0x12a   :  { %699 = vst.msk [vmem:[%s2113_s10 + $0x58] sm:$0x3] %vm692_vm13, %v673_v5  ;;  %v759_v5 = vrot.slane %v757_v56, 2  ;;  %942 = vmatpush.msra.mxu2 %v703_v62 }
 0x12b   :  { %794 = vst [vmem:[#allocation1 + $0x20] ss:$4 sm:$0xff] %v733_v57  ;;  %v701_v57 = vld [vmem:[%s2108_s5 + $0x8] sm:$0xff]  ;;  %1062 = vmatpush.msra.mxu0 %v990_v12  ;;  %v746_v16 = vsel %vm1414_vm6, %v1180_v2, %v745_v48 }
 0x12c   :  { %796 = vst [vmem:[#allocation1 + $0x21] ss:$4 sm:$0xff] %v736_v61  ;;  %v761_v61 = vsel %vm1414_vm6, %v759_v5, %v760_v1 }
 0x12d   :  { %798 = vst [vmem:[#allocation1 + $0x22] ss:$4 sm:$0xff] %v739_v20  ;;  %v988_v20 = vld [vmem:[%s2110_s7] sm:$0xff]  ;;  %1063 = vmatpush.msra.mxu0 %v989_v4 }
 0x12e   :  { %800 = vst [vmem:[#allocation1 + $0x23] ss:$4 sm:$0xff] %v742_v23  ;;  %v755_v23 = vsel %vm1414_vm6, %v753_v58, %v754_v38 }
 0x12f   :  { %786 = vst [vmem:[#allocation1] ss:$4 sm:$0xff] %v721_v26  ;;  %1064 = vmatpush.msra.mxu0 %v988_v20 }
 0x130   :  { %788 = vst [vmem:[#allocation1 + $0x1] ss:$4 sm:$0xff] %v724_v34 }
 0x131   :  { %790 = vst [vmem:[#allocation1 + $0x2] ss:$4 sm:$0xff] %v727_v14 }
 0x132   :  { %697 = vst.msk [vmem:[%s2113_s10 + $0x48] sm:$0xff] %vm687_vm12, %v671_v7  ;;  %v702_v7 = vld [vmem:[%s2108_s5 + $0x10] sm:$0xff] }
 0x133   :  { %943 = vmatpush.msra.mxu2 %v702_v7 }
 0x135   :  { %v803_v8 = vld.sshfl [vmem:[#allocation1 + $0x20] sm:$0xff pattern:$0x73625140]  ;;  %v804_v9 = vld.sshfl [vmem:[#allocation1 + $0x28] sm:$0xff pattern:$0x73625140]  ;;  %944 = vmatpush.msra.mxu2 %v701_v57 }
 0x136   :  { %811 = vst [vmem:[#allocation1 + $0x22] ss:$4 sm:$0xff] %v764_v13 }
 0x137   :  { %812 = vst [vmem:[#allocation1 + $0x23] ss:$4 sm:$0xff] %v767_v50  ;;  %945 = vmatpush.msra.mxu2 %v700_v18 }
 0x138   :  { %809 = vst [vmem:[#allocation1 + $0x20] ss:$4 sm:$0xff] %v758_v60  ;;  %v801_v0 = vld.sshfl [vmem:[#allocation1] sm:$0xff pattern:$0x73625140] }
 0x139   :  { %810 = vst [vmem:[#allocation1 + $0x21] ss:$4 sm:$0xff] %v761_v61  ;;  %845 = vmatmul.f32.vlgmr.msrb.gmra.mxu2 %v801_v0  ;;  %v802_v17 = vld.sshfl [vmem:[#allocation1 + $0x8] sm:$0xff pattern:$0x73625140] }
 0x13a   :  { %1181 = vmatmul.msk.f32.vlgmr.msrb.gmra.mxu3 %vm687_vm12, %v802_v17  ;;  %805 = vst [vmem:[#allocation1] ss:$4 sm:$0xff] %v746_v16 }
 0x13b   :  { %806 = vst [vmem:[#allocation1 + $0x1] ss:$4 sm:$0xff] %v749_v19 }
 0x13c   :  { %807 = vst [vmem:[#allocation1 + $0x2] ss:$4 sm:$0xff] %v752_v22 }
 0x13d   :  { %808 = vst [vmem:[#allocation1 + $0x3] ss:$4 sm:$0xff] %v755_v23 }
 0x140   :  { %v815_v24 = vld.sshfl [vmem:[#allocation1 + $0x20] sm:$0xff pattern:$0x73625140]  ;;  %v816_v28 = vld.sshfl [vmem:[#allocation1 + $0x28] sm:$0xff pattern:$0x73625140] }
 0x141   :  { %848 = vmatmul.f32.gmra.mxu2 %v803_v8  ;;  %895 = vst [vmem:[#allocation1 + $0x20] ss:$4 sm:$0xff] %v1728_v3 }
 0x142   :  { %1182 = vmatmul.msk.f32.gmra.mxu3 %vm687_vm12, %v804_v9  ;;  %897 = vst [vmem:[#allocation1 + $0x21] ss:$4 sm:$0xff] %v1733_v10 }
 0x143   :  { %899 = vst [vmem:[#allocation1 + $0x22] ss:$4 sm:$0xff] %v1735_v11 }
 0x144   :  { %v813_v26 = vld.sshfl [vmem:[#allocation1] sm:$0xff pattern:$0x73625140]  ;;  %v814_v27 = vld.sshfl [vmem:[#allocation1 + $0x8] sm:$0xff pattern:$0x73625140] }
 0x145   :  { %887 = vst [vmem:[#allocation1] ss:$4 sm:$0xff] %v1697_v25 }
 0x146   :  { %889 = vst [vmem:[#allocation1 + $0x1] ss:$4 sm:$0xff] %v1702_v30 }
 0x147   :  { %891 = vst [vmem:[#allocation1 + $0x2] ss:$4 sm:$0xff] %v1704_v36 }
 0x148   :  { %893 = vst [vmem:[#allocation1 + $0x3] ss:$4 sm:$0xff] %v1706_v37 }
 0x149   :  { %851 = vmatmul.f32.gmra.mxu2 %v813_v26  ;;  %901 = vst [vmem:[#allocation1 + $0x23] ss:$4 sm:$0xff] %v1739_v15 }
 0x14a   :  { %1183 = vmatmul.msk.f32.gmra.mxu3 %vm687_vm12, %v814_v27 }
 0x14f   :  { %v902_v42 = vld.sshfl [vmem:[#allocation1] sm:$0xff pattern:$0x73625140]  ;;  %v903_v34 = vld.sshfl [vmem:[#allocation1 + $0x8] sm:$0xff pattern:$0x73625140] }
 0x150   :  { %906 = vst [vmem:[#allocation1] ss:$4 sm:$0xff] %v1786_v63  ;;  %v904_v38 = vld.sshfl [vmem:[#allocation1 + $0x20] sm:$0xff pattern:$0x73625140] }
 0x151   :  { %854 = vmatmul.f32.gmra.mxu2 %v815_v24  ;;  %907 = vst [vmem:[#allocation1 + $0x1] ss:$4 sm:$0xff] %v1788_v39  ;;  %v905_v25 = vld.sshfl [vmem:[#allocation1 + $0x28] sm:$0xff pattern:$0x73625140] }
 0x152   :  { %1184 = vmatmul.msk.f32.gmra.mxu3 %vm687_vm12, %v816_v28  ;;  %908 = vst [vmem:[#allocation1 + $0x2] ss:$4 sm:$0xff] %v1791_v44 }
 0x153   :  { %909 = vst [vmem:[#allocation1 + $0x3] ss:$4 sm:$0xff] %v1814_v6 }
 0x154   :  { %910 = vst [vmem:[#allocation1 + $0x20] ss:$4 sm:$0xff] %v1825_v33 }
 0x155   :  { %911 = vst [vmem:[#allocation1 + $0x21] ss:$4 sm:$0xff] %v1827_v35 }
 0x156   :  { %912 = vst [vmem:[#allocation1 + $0x22] ss:$4 sm:$0xff] %v1829_v46 }
 0x157   :  { %913 = vst [vmem:[#allocation1 + $0x23] ss:$4 sm:$0xff] %v1859_v31 }
 0x159   :  { %946 = vmatmul.f32.vlgmr.msra.gmra.mxu2 %v902_v42 }
 0x15a   :  { %1185 = vmatmul.msk.f32.vlgmr.msra.gmra.mxu3 %vm687_vm12, %v903_v34  ;;  %v914_v63 = vld.sshfl [vmem:[#allocation1] sm:$0xff pattern:$0x73625140]  ;;  %v915_v1 = vld.sshfl [vmem:[#allocation1 + $0x8] sm:$0xff pattern:$0x73625140] }
 0x15b   :  { %1006 = vst [vmem:[#allocation1] ss:$4 sm:$0xff] %v1702_v30 }
 0x15c   :  { %1008 = vst [vmem:[#allocation1 + $0x1] ss:$4 sm:$0xff] %v1704_v36 }
 0x15d   :  { %1010 = vst [vmem:[#allocation1 + $0x2] ss:$4 sm:$0xff] %v1706_v37 }
 0x15e   :  { %1012 = vst [vmem:[#allocation1 + $0x3] ss:$4 sm:$0xff] %v1728_v3  ;;  %v916_v40 = vld.sshfl [vmem:[#allocation1 + $0x20] sm:$0xff pattern:$0x73625140] }
 0x15f   :  { %v917_v43 = vld.sshfl [vmem:[#allocation1 + $0x28] sm:$0xff pattern:$0x73625140] }
 0x160   :  { %1014 = vst [vmem:[#allocation1 + $0x20] ss:$4 sm:$0xff] %v1733_v10 }
 0x161   :  { %949 = vmatmul.f32.gmra.mxu2 %v904_v38  ;;  %1016 = vst [vmem:[#allocation1 + $0x21] ss:$4 sm:$0xff] %v1735_v11 }
 0x162   :  { %1186 = vmatmul.msk.f32.gmra.mxu3 %vm687_vm12, %v905_v25  ;;  %1018 = vst [vmem:[#allocation1 + $0x22] ss:$4 sm:$0xff] %v1739_v15 }
 0x163   :  { %1020 = vst [vmem:[#allocation1 + $0x23] ss:$4 sm:$0xff] %v1778_v29 }
 0x165   :  { %v1021_v30 = vld.sshfl [vmem:[#allocation1] sm:$0xff pattern:$0x73625140]  ;;  %v1022_v14 = vld.sshfl [vmem:[#allocation1 + $0x8] sm:$0xff pattern:$0x73625140] }
 0x166   :  { %1065 = vmatmul.f32.vlgmr.msra.gmra.mxu0 %v1021_v30  ;;  %1189 = vmatmul.msk.f32.vlgmr.msra.gmra.mxu1 %vm687_vm12, %v1022_v14  ;;  %1025 = vst [vmem:[#allocation1] ss:$4 sm:$0xff] %v1788_v39 }
 0x167   :  { %1026 = vst [vmem:[#allocation1 + $0x1] ss:$4 sm:$0xff] %v1791_v44 }
 0x168   :  { %1027 = vst [vmem:[#allocation1 + $0x2] ss:$4 sm:$0xff] %v1814_v6 }
 0x169   :  { %1028 = vst [vmem:[#allocation1 + $0x3] ss:$4 sm:$0xff] %v1825_v33  ;;  %952 = vmatmul.f32.gmra.mxu2 %v914_v63 }
 0x16a   :  { %v1023_v36 = vld.sshfl [vmem:[#allocation1 + $0x20] sm:$0xff pattern:$0x73625140]  ;;  %v1024_v37 = vld.sshfl [vmem:[#allocation1 + $0x28] sm:$0xff pattern:$0x73625140]  ;;  %1187 = vmatmul.msk.f32.gmra.mxu3 %vm687_vm12, %v915_v1 }
 0x16b   :  { %1029 = vst [vmem:[#allocation1 + $0x20] ss:$4 sm:$0xff] %v1827_v35 }
 0x16c   :  { %1030 = vst [vmem:[#allocation1 + $0x21] ss:$4 sm:$0xff] %v1829_v46 }
 0x16d   :  { %1031 = vst [vmem:[#allocation1 + $0x22] ss:$4 sm:$0xff] %v1859_v31 }
 0x16e   :  { %1068 = vmatmul.f32.gmra.mxu0 %v1023_v36  ;;  %1190 = vmatmul.msk.f32.gmra.mxu1 %vm687_vm12, %v1024_v37  ;;  %1032 = vst [vmem:[#allocation1 + $0x23] ss:$4 sm:$0xff] %v1865_v21 }
 0x170   :  { %v1033_v3 = vld.sshfl [vmem:[#allocation1] sm:$0xff pattern:$0x73625140]  ;;  %v1034_v10 = vld.sshfl [vmem:[#allocation1 + $0x8] sm:$0xff pattern:$0x73625140] }
 0x171   :  { %955 = vmatmul.f32.gmra.mxu2 %v916_v40 }
 0x172   :  { %1188 = vmatmul.msk.f32.gmra.mxu3 %vm687_vm12, %v917_v43 }
 0x175   :  { %v1035_v11 = vld.sshfl [vmem:[#allocation1 + $0x20] sm:$0xff pattern:$0x73625140]  ;;  %v1036_v15 = vld.sshfl [vmem:[#allocation1 + $0x28] sm:$0xff pattern:$0x73625140] }
 0x176   :  { %1071 = vmatmul.f32.gmra.mxu0 %v1033_v3  ;;  %1191 = vmatmul.msk.f32.gmra.mxu1 %vm687_vm12, %v1034_v10 }
 0x17e   :  { %1074 = vmatmul.f32.gmra.mxu0 %v1035_v11  ;;  %1192 = vmatmul.msk.f32.gmra.mxu1 %vm687_vm12, %v1036_v15 }
 0x1bc   :  { %v846_v29 = vpop.f32.mrf.mxu2 }
 0x1bd   :  { %v875_v39 = vpop.f32.mrf.mxu3 }
 0x1be   :  { %v876_v21 = vadd.f32 %v875_v39, %v846_v29 }
 0x1c4   :  { %v849_v44 = vpop.f32.mrf.mxu2 }
 0x1c5   :  { %v878_v6 = vpop.f32.mrf.mxu3 }
 0x1c6   :  { %v879_v41 = vadd.f32 %v878_v6, %v849_v44 }
 0x1cc   :  { %v852_v33 = vpop.f32.mrf.mxu2 }
 0x1cd   :  { %v881_v35 = vpop.f32.mrf.mxu3 }
 0x1ce   :  { %v882_v8 = vadd.f32 %v881_v35, %v852_v33 }
 0x1d4   :  { %v855_v46 = vpop.f32.mrf.mxu2 }
 0x1d5   :  { %v884_v31 = vpop.f32.mrf.mxu3 }
 0x1d6   :  { %v885_v4 = vadd.f32 %v884_v31, %v855_v46 }
 0x1dc   :  { %v947_v56 = vpop.f32.mrf.mxu2 }
 0x1dd   :  { %v976_v45 = vpop.f32.mrf.mxu3  ;;  %v948_v47 = vadd.f32 %v947_v56, %v876_v21 }
 0x1df   :  { %v977_v48 = vadd.f32 %v976_v45, %v948_v47 }
 0x1e3   :  { %v1066_v49 = vpop.f32.mrf.mxu0  ;;  %v1095_v51 = vpop.f32.mrf.mxu1 }
 0x1e4   :  { %v1096_v52 = vadd.f32 %v1095_v51, %v1066_v49  ;;  %v950_v54 = vpop.f32.mrf.mxu2 }
 0x1e5   :  { %v979_v62 = vpop.f32.mrf.mxu3  ;;  %v951_v2 = vadd.f32 %v950_v54, %v879_v41 }
 0x1e6   :  { %v1107_v53 = vadd.f32 %v1096_v52, %v977_v48 }
 0x1e7   :  { %v980_v7 = vadd.f32 %v979_v62, %v951_v2 }
 0x1e8   :  { %v1115_v5 = vadd.f32 %v1196_v59, %v1107_v53 }
 0x1ea   :  { %1119 = vst [vmem:[#allocation2] sm:$0xff] %v1115_v5 }
 0x1eb   :  { %v1069_v12 = vpop.f32.mrf.mxu0  ;;  %v1098_v13 = vpop.f32.mrf.mxu1 }
 0x1ec   :  { %v1099_v9 = vadd.f32 %v1098_v13, %v1069_v12  ;;  %v953_v32 = vpop.f32.mrf.mxu2 }
 0x1ed   :  { %v954_v55 = vadd.f32 %v953_v32, %v882_v8  ;;  %v982_v58 = vpop.f32.mrf.mxu3 }
 0x1ee   :  { %v1108_v50 = vadd.f32 %v1099_v9, %v980_v7 }
 0x1ef   :  { %v983_v57 = vadd.f32 %v982_v58, %v954_v55 }
 0x1f0   :  { %v1116_v60 = vadd.f32 %v1196_v59, %v1108_v50 }
 0x1f2   :  { %1120 = vst [vmem:[#allocation2 + $0x8] sm:$0xff] %v1116_v60 }
 0x1f3   :  { %v1072_v61 = vpop.f32.mrf.mxu0  ;;  %v1101_v0 = vpop.f32.mrf.mxu1 }
 0x1f4   :  { %v1102_v16 = vadd.f32 %v1101_v0, %v1072_v61  ;;  %v956_v17 = vpop.f32.mrf.mxu2 }
 0x1f5   :  { %v957_v19 = vadd.f32 %v956_v17, %v885_v4  ;;  %v985_v22 = vpop.f32.mrf.mxu3 }
 0x1f6   :  { %v1109_v18 = vadd.f32 %v1102_v16, %v983_v57 }
 0x1f7   :  { %v986_v23 = vadd.f32 %v985_v22, %v957_v19 }
 0x1f8   :  { %v1117_v20 = vadd.f32 %v1196_v59, %v1109_v18 }
 0x1fa   :  { %1121 = vst [vmem:[#allocation2 + $0x10] sm:$0xff] %v1117_v20 }
 0x1fb   :  { %v1075_v24 = vpop.f32.mrf.mxu0  ;;  %v1104_v28 = vpop.f32.mrf.mxu1 }
 0x1fc   :  { %v1105_v26 = vadd.f32 %v1104_v28, %v1075_v24 }
 0x1fe   :  { %v1110_v27 = vadd.f32 %v1105_v26, %v986_v23 }
 0x200   :  { %v1118_v42 = vadd.f32 %v1196_v59, %v1110_v27 }
 0x202   :  { %1122 = vst [vmem:[#allocation2 + $0x18] sm:$0xff] %v1118_v42 }
 0x203   :  { %1137 = dma.vmem_to_hbm [thread:$0]  %s1130_s28, 512, %s1132_s4, [#allocation3], %s1224_s30, %s1224_s30, %s1225_s12  }
 0x204   :  { %1221 = dma.done.wait [#allocation3], 512  }
 0x205   :  { %1222 = vsyncadd [#allocation3], 4294966784 }
 0x206   :  { %1144 = vsyncpa [#allocation3], 1 }

</bundles_post_ra>
